<compile_context>
chip_gen: v5e
topology: v5e:2x2
jax: 0.10.0
libtpu: 0.0.40
codegen_flags: <defaults>
</compile_context>

<pallas_src>
import functools

import jax
import jax.numpy as jnp
from jax import lax
from jax.experimental import pallas as pl
from jax.experimental.pallas import tpu as pltpu

IN_CHANNEL = 4
DEPTH = 32
DILATIONS = (6, 12, 18)
PAD = max(DILATIONS)     # rows padded once by the max dilation
GUARD = PAD              # guard band on the flattened axis (keeps extreme shifts in-bounds)


# ============================ Pallas kernel ===================================
def _aspp_kernel(x_ref, col_ref, wt_ref, wimg_ref, bias_ref, o_ref, *, H, W, taps):
    """Fused ASPP for one batch element.

    x_ref:    (1, Cin, L)      row-padded, flattened input (L = (H+2*PAD)*W + 2*GUARD)
    col_ref:  (1, H*W)  int32  output column index (w) per flat position
    wt_ref:   (T, depth, Cin)  folded tap weights (branch conv . output conv)
    wimg_ref: (depth, Cin)     folded image-pool path weight
    bias_ref: (depth, 1)       all biases folded through the output conv
    o_ref:    (1, depth, H*W)
    """
    HW = H * W
    depth = o_ref.shape[1]
    base = GUARD + PAD * W                      # flat index of original (row 0, col 0)

    col = col_ref[...]                          # (1, HW) int32

    # Image-pool branch: GAP over the valid region, then the folded 1x1 convs.
    # Constant over space -> folded into the accumulator init together with bias.
    xc = x_ref[0, :, base:base + HW]                              # (Cin, HW)
    gap = jnp.sum(xc, axis=1, keepdims=True) * (1.0 / HW)         # (Cin, 1)
    img = jnp.dot(wimg_ref[...], gap,
                  preferred_element_type=jnp.float32)             # (depth, 1)
    acc = jnp.broadcast_to(img + bias_ref[...], (depth, HW))      # hoisted broadcast

    # All branch convs + the output 1x1 conv: short, statically unrolled list of
    # small MXU dots over contiguous lane-shifted windows of the flat input.
    for t, (drow, dcol) in enumerate(taps):
        shift = base + drow * W + dcol
        xs = x_ref[0, :, shift:shift + HW]                        # (Cin, HW)
        if dcol != 0:
            # Zero out positions whose column would fall in the conv's W-padding
            # (a lane shift of the flat array wraps into the neighbouring row).
            valid = jnp.logical_and(col + dcol >= 0, col + dcol < W)
            xs = jnp.where(valid, xs, 0.0)
        acc = acc + jnp.dot(wt_ref[t], xs, preferred_element_type=jnp.float32)

    o_ref[0] = acc                                                # single lane-dense store


# ============================ wrapper =========================================
def aspp_forward(x_nchw, taps, w_taps, w_img_fold, bias):
    """ASPP forward.  x_nchw: (B, Cin, H, W) float32 (PyTorch layout)."""
    B, Cin, H, W = x_nchw.shape
    depth = bias.shape[0]
    HW = H * W
    Hp = H + 2 * PAD
    L = Hp * W + 2 * GUARD

    # Pad rows only (max padding, once); column shifts become constant lane
    # shifts of the row-major flattened tensor.  Guard band keeps every static
    # slice in-bounds even for the largest dilation.
    xh = jnp.pad(x_nchw, ((0, 0), (0, 0), (PAD, PAD), (0, 0)))
    x_flat = jnp.pad(xh.reshape(B, Cin, Hp * W), ((0, 0), (0, 0), (GUARD, GUARD)))

    col_ids = jnp.tile(jnp.arange(W, dtype=jnp.int32), H)[None, :]     # (1, HW)

    T = w_taps.shape[0]
    kernel = functools.partial(_aspp_kernel, H=H, W=W, taps=taps)
    out = pl.pallas_call(
        kernel,
        out_shape=jax.ShapeDtypeStruct((B, depth, HW), jnp.float32),
        grid=(B,),
        in_specs=[
            pl.BlockSpec((1, Cin, L), lambda b: (b, 0, 0)),
            pl.BlockSpec((1, HW), lambda b: (0, 0)),
            pl.BlockSpec((T, depth, Cin), lambda b: (0, 0, 0)),
            pl.BlockSpec((depth, Cin), lambda b: (0, 0)),
            pl.BlockSpec((depth, 1), lambda b: (0, 0)),
        ],
        out_specs=pl.BlockSpec((1, depth, HW), lambda b: (b, 0, 0)),
        compiler_params=pltpu.CompilerParams(dimension_semantics=("parallel",)),
    )(x_flat, col_ids, w_taps, w_img_fold, bias)

    # (B, depth, H*W) reshapes directly to the NCHW result (no transpose needed).
    return out.reshape(B, depth, H, W)


# ===================== parameter folding (trace-time, data-free) ==============
def fold_params(p, H, W):
    """Fold the output 1x1 conv + all biases into per-tap (depth, Cin) weights."""
    depth = DEPTH
    hi = lax.Precision.HIGHEST
    wo = p["w_out"][:, :, 0, 0]                                  # (depth, 5*depth)
    wo_img = wo[:, 0 * depth:1 * depth]
    wo_b1 = wo[:, 1 * depth:2 * depth]
    wo_d = {d: wo[:, (2 + i) * depth:(3 + i) * depth] for i, d in enumerate(DILATIONS)}

    tap_w = {}

    def add_tap(drow, dcol, w_depth_cin):
        # Drop taps whose window lies entirely in the conv's zero padding.
        if drow >= H or drow <= -H or dcol >= W or dcol <= -W:
            return
        tap_w[(drow, dcol)] = tap_w.get((drow, dcol), 0.0) + w_depth_cin

    # atrous_block1: 1x1 conv, padding 0  -> single tap at (0, 0)
    add_tap(0, 0, jnp.dot(wo_b1, p["w_b1"][:, :, 0, 0], precision=hi))
    # atrous_block6/12/18: 3x3 conv, padding = dilation = d
    for d in DILATIONS:
        w = p[f"w_b{d}"]                                         # (depth, Cin, 3, 3)
        for kh in range(3):
            for kw in range(3):
                add_tap((kh - 1) * d, (kw - 1) * d,
                        jnp.dot(wo_d[d], w[:, :, kh, kw], precision=hi))

    taps = tuple(sorted(tap_w.keys()))
    w_taps = jnp.stack([tap_w[t] for t in taps], axis=0)         # (T, depth, Cin)

    w_img_fold = jnp.dot(wo_img, p["w_img"][:, :, 0, 0], precision=hi)   # (depth, Cin)
    bias = (p["b_out"]
            + jnp.dot(wo_b1, p["b_b1"], precision=hi)
            + jnp.dot(wo_img, p["b_img"], precision=hi)
            + sum(jnp.dot(wo_d[d], p[f"b_b{d}"], precision=hi) for d in DILATIONS))
    return taps, w_taps, w_img_fold, bias[:, None]               # bias: (depth, 1)


# ===================== parameters (deterministic, synthetic) ==================
def init_params(key):
    ks = iter(jax.random.split(key, 12))

    def conv_w(k, cout, cin, kh, kw):
        return (jax.random.normal(k, (cout, cin, kh, kw), jnp.float32)
                / jnp.sqrt(cin * kh * kw))

    p = {}
    p["w_img"] = conv_w(next(ks), DEPTH, IN_CHANNEL, 1, 1)
    p["b_img"] = 0.1 * jax.random.normal(next(ks), (DEPTH,), jnp.float32)
    p["w_b1"] = conv_w(next(ks), DEPTH, IN_CHANNEL, 1, 1)
    p["b_b1"] = 0.1 * jax.random.normal(next(ks), (DEPTH,), jnp.float32)
    for d in DILATIONS:
        p[f"w_b{d}"] = conv_w(next(ks), DEPTH, IN_CHANNEL, 3, 3)
        p[f"b_b{d}"] = 0.1 * jax.random.normal(next(ks), (DEPTH,), jnp.float32)
    p["w_out"] = conv_w(next(ks), DEPTH, 5 * DEPTH, 1, 1)
    p["b_out"] = 0.1 * jax.random.normal(next(ks), (DEPTH,), jnp.float32)
    return p


# ===================== pure-JAX reference (NCHW, mirrors PyTorch) =============
def aspp_reference(x, p):
    B, Cin, H, W = x.shape
    dn = ("NCHW", "OIHW", "NCHW")
    hi = lax.Precision.HIGHEST

    gap = jnp.mean(x, axis=(2, 3), keepdims=True)                # AdaptiveAvgPool2d(1)
    img = lax.conv_general_dilated(gap, p["w_img"], (1, 1), "VALID",
                                   dimension_numbers=dn, precision=hi)
    img = img + p["b_img"][None, :, None, None]
    img = jnp.broadcast_to(img, (B, DEPTH, H, W))                # bilinear 1x1 -> (H, W)

    b1 = lax.conv_general_dilated(x, p["w_b1"], (1, 1), "VALID",
                                  dimension_numbers=dn, precision=hi)
    b1 = b1 + p["b_b1"][None, :, None, None]

    branches = [img, b1]
    for d in DILATIONS:
        y = lax.conv_general_dilated(x, p[f"w_b{d}"], (1, 1), [(d, d), (d, d)],
                                     rhs_dilation=(d, d),
                                     dimension_numbers=dn, precision=hi)
        branches.append(y + p[f"b_b{d}"][None, :, None, None])

    cat = jnp.concatenate(branches, axis=1)                      # (B, 5*depth, H, W)
    out = lax.conv_general_dilated(cat, p["w_out"], (1, 1), "VALID",
                                   dimension_numbers=dn, precision=hi)
    return out + p["b_out"][None, :, None, None]


if __name__ == "__main__":
    key = jax.random.PRNGKey(0)
    k_x, k_p = jax.random.split(key)
    B, H, W = 2, 16, 16
    x = jax.random.normal(k_x, (B, IN_CHANNEL, H, W), jnp.float32)   # NCHW input
    params = init_params(k_p)
    taps, w_taps, w_img_fold, bias = fold_params(params, H, W)

    out = jax.block_until_ready(aspp_forward(x, taps, w_taps, w_img_fold, bias))
    ref = jax.block_until_ready(aspp_reference(x, params))

    assert out.shape == ref.shape == (B, DEPTH, H, W)
    max_err = float(jnp.max(jnp.abs(out - ref)))
    if not jnp.allclose(out, ref, atol=2e-4, rtol=2e-4):
        raise AssertionError(f"mismatch vs reference, max abs err {max_err}")
    print("KERNEL_OK")
</pallas_src>

<mosaic_0001>
module attributes {stable_mosaic.version = 11 : i64} {
  func.func @_aspp_kernel(%arg0: i32, %arg1: memref<1x4x868xf32, #tpu.memory_space<vmem>>, %arg2: memref<1x256xi32, #tpu.memory_space<vmem>>, %arg3: memref<17x32x4xf32, #tpu.memory_space<vmem>>, %arg4: memref<32x4xf32, #tpu.memory_space<vmem>>, %arg5: memref<32x1xf32, #tpu.memory_space<vmem>>, %arg6: memref<1x32x256xf32, #tpu.memory_space<vmem>>) attributes {dimension_semantics = [#tpu.dimension_semantics<parallel>], iteration_bounds = array<i64: 2>, scalar_prefetch = 0 : i64, scratch_operands = 0 : i64, tpu.core_type = #tpu.core_type<tc>, window_params = [{transform_indices = @transform_0, window_bounds = array<i64: 1, 4, 868>}, {pipeline_mode = #tpu.pipeline_mode<synchronous>, transform_indices = @transform_1, window_bounds = array<i64: 1, 256>}, {pipeline_mode = #tpu.pipeline_mode<synchronous>, transform_indices = @transform_2, window_bounds = array<i64: 17, 32, 4>}, {pipeline_mode = #tpu.pipeline_mode<synchronous>, transform_indices = @transform_3, window_bounds = array<i64: 32, 4>}, {pipeline_mode = #tpu.pipeline_mode<synchronous>, transform_indices = @transform_4, window_bounds = array<i64: 32, 1>}, {transform_indices = @transform_5, window_bounds = array<i64: 1, 32, 256>}]} {
    %c0 = arith.constant 0 : index
    %c0_0 = arith.constant 0 : index
    %0 = vector.load %arg2[%c0, %c0_0] : memref<1x256xi32, #tpu.memory_space<vmem>>, vector<1x256xi32>
    %c0_1 = arith.constant 0 : index
    %c0_2 = arith.constant 0 : index
    %c306 = arith.constant 306 : index
    %1 = vector.load %arg1[%c0_1, %c0_2, %c306] : memref<1x4x868xf32, #tpu.memory_space<vmem>>, vector<1x4x256xf32>
    %2 = vector.shape_cast %1 : vector<1x4x256xf32> to vector<4x256xf32>
    %cst = arith.constant dense<0.000000e+00> : vector<4xf32>
    %3 = vector.multi_reduction <add>, %2, %cst [1] : vector<4x256xf32> to vector<4xf32>
    %4 = vector.shape_cast %3 : vector<4xf32> to vector<4x1xf32>
    %cst_3 = arith.constant 3.906250e-03 : f32
    %5 = vector.broadcast %cst_3 : f32 to vector<4x1xf32>
    %6 = arith.mulf %4, %5 : vector<4x1xf32>
    %c0_4 = arith.constant 0 : index
    %c0_5 = arith.constant 0 : index
    %7 = vector.load %arg4[%c0_4, %c0_5] : memref<32x4xf32, #tpu.memory_space<vmem>>, vector<32x4xf32>
    %cst_6 = arith.constant dense<0.000000e+00> : vector<32x1xf32>
    %8 = tpu.matmul %7, %6, %cst_6 {dimension_numbers = #tpu.dot_dimension_numbers<[1], [0], [0], [1], [0, 0, 1, 1], [], []>} : vector<32x4xf32>, vector<4x1xf32>, vector<32x1xf32> -> vector<32x1xf32>
    %c0_7 = arith.constant 0 : index
    %c0_8 = arith.constant 0 : index
    %9 = vector.load %arg5[%c0_7, %c0_8] : memref<32x1xf32, #tpu.memory_space<vmem>>, vector<32x1xf32>
    %10 = arith.addf %8, %9 : vector<32x1xf32>
    %11 = vector.shape_cast %10 : vector<32x1xf32> to vector<32x1xf32>
    %12 = vector.broadcast %11 : vector<32x1xf32> to vector<32x256xf32>
    %c0_9 = arith.constant 0 : index
    %c0_10 = arith.constant 0 : index
    %c102 = arith.constant 102 : index
    %13 = vector.load %arg1[%c0_9, %c0_10, %c102] : memref<1x4x868xf32, #tpu.memory_space<vmem>>, vector<1x4x256xf32>
    %14 = vector.shape_cast %13 : vector<1x4x256xf32> to vector<4x256xf32>
    %c-12_i32 = arith.constant -12 : i32
    %15 = vector.broadcast %c-12_i32 : i32 to vector<1x256xi32>
    %16 = arith.addi %0, %15 : vector<1x256xi32>
    %c0_i32 = arith.constant 0 : i32
    %17 = vector.broadcast %c0_i32 : i32 to vector<1x256xi32>
    %18 = arith.cmpi sge, %16, %17 : vector<1x256xi32>
    %c-12_i32_11 = arith.constant -12 : i32
    %19 = vector.broadcast %c-12_i32_11 : i32 to vector<1x256xi32>
    %20 = arith.addi %0, %19 : vector<1x256xi32>
    %c16_i32 = arith.constant 16 : i32
    %21 = vector.broadcast %c16_i32 : i32 to vector<1x256xi32>
    %22 = arith.cmpi slt, %20, %21 : vector<1x256xi32>
    %23 = arith.andi %18, %22 : vector<1x256xi1>
    %cst_12 = arith.constant 0.000000e+00 : f32
    %24 = vector.shape_cast %23 : vector<1x256xi1> to vector<1x256xi1>
    %25 = vector.broadcast %24 : vector<1x256xi1> to vector<4x256xi1>
    %26 = vector.broadcast %cst_12 : f32 to vector<4x256xf32>
    %27 = arith.select %25, %14, %26 : vector<4x256xi1>, vector<4x256xf32>
    %c0_13 = arith.constant 0 : index
    %c0_14 = arith.constant 0 : index
    %c0_15 = arith.constant 0 : index
    %28 = vector.load %arg3[%c0_13, %c0_14, %c0_15] : memref<17x32x4xf32, #tpu.memory_space<vmem>>, vector<1x32x4xf32>
    %29 = vector.shape_cast %28 : vector<1x32x4xf32> to vector<32x4xf32>
    %cst_16 = arith.constant dense<0.000000e+00> : vector<32x256xf32>
    %30 = tpu.matmul %29, %27, %cst_16 {dimension_numbers = #tpu.dot_dimension_numbers<[1], [0], [0], [1], [0, 0, 1, 1], [], []>} : vector<32x4xf32>, vector<4x256xf32>, vector<32x256xf32> -> vector<32x256xf32>
    %31 = arith.addf %12, %30 : vector<32x256xf32>
    %c0_17 = arith.constant 0 : index
    %c0_18 = arith.constant 0 : index
    %c114 = arith.constant 114 : index
    %32 = vector.load %arg1[%c0_17, %c0_18, %c114] : memref<1x4x868xf32, #tpu.memory_space<vmem>>, vector<1x4x256xf32>
    %33 = vector.shape_cast %32 : vector<1x4x256xf32> to vector<4x256xf32>
    %c1 = arith.constant 1 : index
    %c0_19 = arith.constant 0 : index
    %c0_20 = arith.constant 0 : index
    %34 = vector.load %arg3[%c1, %c0_19, %c0_20] : memref<17x32x4xf32, #tpu.memory_space<vmem>>, vector<1x32x4xf32>
    %35 = vector.shape_cast %34 : vector<1x32x4xf32> to vector<32x4xf32>
    %cst_21 = arith.constant dense<0.000000e+00> : vector<32x256xf32>
    %36 = tpu.matmul %35, %33, %cst_21 {dimension_numbers = #tpu.dot_dimension_numbers<[1], [0], [0], [1], [0, 0, 1, 1], [], []>} : vector<32x4xf32>, vector<4x256xf32>, vector<32x256xf32> -> vector<32x256xf32>
    %37 = arith.addf %31, %36 : vector<32x256xf32>
    %c0_22 = arith.constant 0 : index
    %c0_23 = arith.constant 0 : index
    %c126 = arith.constant 126 : index
    %38 = vector.load %arg1[%c0_22, %c0_23, %c126] : memref<1x4x868xf32, #tpu.memory_space<vmem>>, vector<1x4x256xf32>
    %39 = vector.shape_cast %38 : vector<1x4x256xf32> to vector<4x256xf32>
    %c12_i32 = arith.constant 12 : i32
    %40 = vector.broadcast %c12_i32 : i32 to vector<1x256xi32>
    %41 = arith.addi %0, %40 : vector<1x256xi32>
    %c0_i32_24 = arith.constant 0 : i32
    %42 = vector.broadcast %c0_i32_24 : i32 to vector<1x256xi32>
    %43 = arith.cmpi sge, %41, %42 : vector<1x256xi32>
    %c12_i32_25 = arith.constant 12 : i32
    %44 = vector.broadcast %c12_i32_25 : i32 to vector<1x256xi32>
    %45 = arith.addi %0, %44 : vector<1x256xi32>
    %c16_i32_26 = arith.constant 16 : i32
    %46 = vector.broadcast %c16_i32_26 : i32 to vector<1x256xi32>
    %47 = arith.cmpi slt, %45, %46 : vector<1x256xi32>
    %48 = arith.andi %43, %47 : vector<1x256xi1>
    %cst_27 = arith.constant 0.000000e+00 : f32
    %49 = vector.shape_cast %48 : vector<1x256xi1> to vector<1x256xi1>
    %50 = vector.broadcast %49 : vector<1x256xi1> to vector<4x256xi1>
    %51 = vector.broadcast %cst_27 : f32 to vector<4x256xf32>
    %52 = arith.select %50, %39, %51 : vector<4x256xi1>, vector<4x256xf32>
    %c2 = arith.constant 2 : index
    %c0_28 = arith.constant 0 : index
    %c0_29 = arith.constant 0 : index
    %53 = vector.load %arg3[%c2, %c0_28, %c0_29] : memref<17x32x4xf32, #tpu.memory_space<vmem>>, vector<1x32x4xf32>
    %54 = vector.shape_cast %53 : vector<1x32x4xf32> to vector<32x4xf32>
    %cst_30 = arith.constant dense<0.000000e+00> : vector<32x256xf32>
    %55 = tpu.matmul %54, %52, %cst_30 {dimension_numbers = #tpu.dot_dimension_numbers<[1], [0], [0], [1], [0, 0, 1, 1], [], []>} : vector<32x4xf32>, vector<4x256xf32>, vector<32x256xf32> -> vector<32x256xf32>
    %56 = arith.addf %37, %55 : vector<32x256xf32>
    %c0_31 = arith.constant 0 : index
    %c0_32 = arith.constant 0 : index
    %c204 = arith.constant 204 : index
    %57 = vector.load %arg1[%c0_31, %c0_32, %c204] : memref<1x4x868xf32, #tpu.memory_space<vmem>>, vector<1x4x256xf32>
    %58 = vector.shape_cast %57 : vector<1x4x256xf32> to vector<4x256xf32>
    %c-6_i32 = arith.constant -6 : i32
    %59 = vector.broadcast %c-6_i32 : i32 to vector<1x256xi32>
    %60 = arith.addi %0, %59 : vector<1x256xi32>
    %c0_i32_33 = arith.constant 0 : i32
    %61 = vector.broadcast %c0_i32_33 : i32 to vector<1x256xi32>
    %62 = arith.cmpi sge, %60, %61 : vector<1x256xi32>
    %c-6_i32_34 = arith.constant -6 : i32
    %63 = vector.broadcast %c-6_i32_34 : i32 to vector<1x256xi32>
    %64 = arith.addi %0, %63 : vector<1x256xi32>
    %c16_i32_35 = arith.constant 16 : i32
    %65 = vector.broadcast %c16_i32_35 : i32 to vector<1x256xi32>
    %66 = arith.cmpi slt, %64, %65 : vector<1x256xi32>
    %67 = arith.andi %62, %66 : vector<1x256xi1>
    %cst_36 = arith.constant 0.000000e+00 : f32
    %68 = vector.shape_cast %67 : vector<1x256xi1> to vector<1x256xi1>
    %69 = vector.broadcast %68 : vector<1x256xi1> to vector<4x256xi1>
    %70 = vector.broadcast %cst_36 : f32 to vector<4x256xf32>
    %71 = arith.select %69, %58, %70 : vector<4x256xi1>, vector<4x256xf32>
    %c3 = arith.constant 3 : index
    %c0_37 = arith.constant 0 : index
    %c0_38 = arith.constant 0 : index
    %72 = vector.load %arg3[%c3, %c0_37, %c0_38] : memref<17x32x4xf32, #tpu.memory_space<vmem>>, vector<1x32x4xf32>
    %73 = vector.shape_cast %72 : vector<1x32x4xf32> to vector<32x4xf32>
    %cst_39 = arith.constant dense<0.000000e+00> : vector<32x256xf32>
    %74 = tpu.matmul %73, %71, %cst_39 {dimension_numbers = #tpu.dot_dimension_numbers<[1], [0], [0], [1], [0, 0, 1, 1], [], []>} : vector<32x4xf32>, vector<4x256xf32>, vector<32x256xf32> -> vector<32x256xf32>
    %75 = arith.addf %56, %74 : vector<32x256xf32>
    %c0_40 = arith.constant 0 : index
    %c0_41 = arith.constant 0 : index
    %c210 = arith.constant 210 : index
    %76 = vector.load %arg1[%c0_40, %c0_41, %c210] : memref<1x4x868xf32, #tpu.memory_space<vmem>>, vector<1x4x256xf32>
    %77 = vector.shape_cast %76 : vector<1x4x256xf32> to vector<4x256xf32>
    %c4 = arith.constant 4 : index
    %c0_42 = arith.constant 0 : index
    %c0_43 = arith.constant 0 : index
    %78 = vector.load %arg3[%c4, %c0_42, %c0_43] : memref<17x32x4xf32, #tpu.memory_space<vmem>>, vector<1x32x4xf32>
    %79 = vector.shape_cast %78 : vector<1x32x4xf32> to vector<32x4xf32>
    %cst_44 = arith.constant dense<0.000000e+00> : vector<32x256xf32>
    %80 = tpu.matmul %79, %77, %cst_44 {dimension_numbers = #tpu.dot_dimension_numbers<[1], [0], [0], [1], [0, 0, 1, 1], [], []>} : vector<32x4xf32>, vector<4x256xf32>, vector<32x256xf32> -> vector<32x256xf32>
    %81 = arith.addf %75, %80 : vector<32x256xf32>
    %c0_45 = arith.constant 0 : index
    %c0_46 = arith.constant 0 : index
    %c216 = arith.constant 216 : index
    %82 = vector.load %arg1[%c0_45, %c0_46, %c216] : memref<1x4x868xf32, #tpu.memory_space<vmem>>, vector<1x4x256xf32>
    %83 = vector.shape_cast %82 : vector<1x4x256xf32> to vector<4x256xf32>
    %c6_i32 = arith.constant 6 : i32
    %84 = vector.broadcast %c6_i32 : i32 to vector<1x256xi32>
    %85 = arith.addi %0, %84 : vector<1x256xi32>
    %c0_i32_47 = arith.constant 0 : i32
    %86 = vector.broadcast %c0_i32_47 : i32 to vector<1x256xi32>
    %87 = arith.cmpi sge, %85, %86 : vector<1x256xi32>
    %c6_i32_48 = arith.constant 6 : i32
    %88 = vector.broadcast %c6_i32_48 : i32 to vector<1x256xi32>
    %89 = arith.addi %0, %88 : vector<1x256xi32>
    %c16_i32_49 = arith.constant 16 : i32
    %90 = vector.broadcast %c16_i32_49 : i32 to vector<1x256xi32>
    %91 = arith.cmpi slt, %89, %90 : vector<1x256xi32>
    %92 = arith.andi %87, %91 : vector<1x256xi1>
    %cst_50 = arith.constant 0.000000e+00 : f32
    %93 = vector.shape_cast %92 : vector<1x256xi1> to vector<1x256xi1>
    %94 = vector.broadcast %93 : vector<1x256xi1> to vector<4x256xi1>
    %95 = vector.broadcast %cst_50 : f32 to vector<4x256xf32>
    %96 = arith.select %94, %83, %95 : vector<4x256xi1>, vector<4x256xf32>
    %c5 = arith.constant 5 : index
    %c0_51 = arith.constant 0 : index
    %c0_52 = arith.constant 0 : index
    %97 = vector.load %arg3[%c5, %c0_51, %c0_52] : memref<17x32x4xf32, #tpu.memory_space<vmem>>, vector<1x32x4xf32>
    %98 = vector.shape_cast %97 : vector<1x32x4xf32> to vector<32x4xf32>
    %cst_53 = arith.constant dense<0.000000e+00> : vector<32x256xf32>
    %99 = tpu.matmul %98, %96, %cst_53 {dimension_numbers = #tpu.dot_dimension_numbers<[1], [0], [0], [1], [0, 0, 1, 1], [], []>} : vector<32x4xf32>, vector<4x256xf32>, vector<32x256xf32> -> vector<32x256xf32>
    %100 = arith.addf %81, %99 : vector<32x256xf32>
    %c0_54 = arith.constant 0 : index
    %c0_55 = arith.constant 0 : index
    %c294 = arith.constant 294 : index
    %101 = vector.load %arg1[%c0_54, %c0_55, %c294] : memref<1x4x868xf32, #tpu.memory_space<vmem>>, vector<1x4x256xf32>
    %102 = vector.shape_cast %101 : vector<1x4x256xf32> to vector<4x256xf32>
    %c-12_i32_56 = arith.constant -12 : i32
    %103 = vector.broadcast %c-12_i32_56 : i32 to vector<1x256xi32>
    %104 = arith.addi %0, %103 : vector<1x256xi32>
    %c0_i32_57 = arith.constant 0 : i32
    %105 = vector.broadcast %c0_i32_57 : i32 to vector<1x256xi32>
    %106 = arith.cmpi sge, %104, %105 : vector<1x256xi32>
    %c-12_i32_58 = arith.constant -12 : i32
    %107 = vector.broadcast %c-12_i32_58 : i32 to vector<1x256xi32>
    %108 = arith.addi %0, %107 : vector<1x256xi32>
    %c16_i32_59 = arith.constant 16 : i32
    %109 = vector.broadcast %c16_i32_59 : i32 to vector<1x256xi32>
    %110 = arith.cmpi slt, %108, %109 : vector<1x256xi32>
    %111 = arith.andi %106, %110 : vector<1x256xi1>
    %cst_60 = arith.constant 0.000000e+00 : f32
    %112 = vector.shape_cast %111 : vector<1x256xi1> to vector<1x256xi1>
    %113 = vector.broadcast %112 : vector<1x256xi1> to vector<4x256xi1>
    %114 = vector.broadcast %cst_60 : f32 to vector<4x256xf32>
    %115 = arith.select %113, %102, %114 : vector<4x256xi1>, vector<4x256xf32>
    %c6 = arith.constant 6 : index
    %c0_61 = arith.constant 0 : index
    %c0_62 = arith.constant 0 : index
    %116 = vector.load %arg3[%c6, %c0_61, %c0_62] : memref<17x32x4xf32, #tpu.memory_space<vmem>>, vector<1x32x4xf32>
    %117 = vector.shape_cast %116 : vector<1x32x4xf32> to vector<32x4xf32>
    %cst_63 = arith.constant dense<0.000000e+00> : vector<32x256xf32>
    %118 = tpu.matmul %117, %115, %cst_63 {dimension_numbers = #tpu.dot_dimension_numbers<[1], [0], [0], [1], [0, 0, 1, 1], [], []>} : vector<32x4xf32>, vector<4x256xf32>, vector<32x256xf32> -> vector<32x256xf32>
    %119 = arith.addf %100, %118 : vector<32x256xf32>
    %c0_64 = arith.constant 0 : index
    %c0_65 = arith.constant 0 : index
    %c300 = arith.constant 300 : index
    %120 = vector.load %arg1[%c0_64, %c0_65, %c300] : memref<1x4x868xf32, #tpu.memory_space<vmem>>, vector<1x4x256xf32>
    %121 = vector.shape_cast %120 : vector<1x4x256xf32> to vector<4x256xf32>
    %c-6_i32_66 = arith.constant -6 : i32
    %122 = vector.broadcast %c-6_i32_66 : i32 to vector<1x256xi32>
    %123 = arith.addi %0, %122 : vector<1x256xi32>
    %c0_i32_67 = arith.constant 0 : i32
    %124 = vector.broadcast %c0_i32_67 : i32 to vector<1x256xi32>
    %125 = arith.cmpi sge, %123, %124 : vector<1x256xi32>
    %c-6_i32_68 = arith.constant -6 : i32
    %126 = vector.broadcast %c-6_i32_68 : i32 to vector<1x256xi32>
    %127 = arith.addi %0, %126 : vector<1x256xi32>
    %c16_i32_69 = arith.constant 16 : i32
    %128 = vector.broadcast %c16_i32_69 : i32 to vector<1x256xi32>
    %129 = arith.cmpi slt, %127, %128 : vector<1x256xi32>
    %130 = arith.andi %125, %129 : vector<1x256xi1>
    %cst_70 = arith.constant 0.000000e+00 : f32
    %131 = vector.shape_cast %130 : vector<1x256xi1> to vector<1x256xi1>
    %132 = vector.broadcast %131 : vector<1x256xi1> to vector<4x256xi1>
    %133 = vector.broadcast %cst_70 : f32 to vector<4x256xf32>
    %134 = arith.select %132, %121, %133 : vector<4x256xi1>, vector<4x256xf32>
    %c7 = arith.constant 7 : index
    %c0_71 = arith.constant 0 : index
    %c0_72 = arith.constant 0 : index
    %135 = vector.load %arg3[%c7, %c0_71, %c0_72] : memref<17x32x4xf32, #tpu.memory_space<vmem>>, vector<1x32x4xf32>
    %136 = vector.shape_cast %135 : vector<1x32x4xf32> to vector<32x4xf32>
    %cst_73 = arith.constant dense<0.000000e+00> : vector<32x256xf32>
    %137 = tpu.matmul %136, %134, %cst_73 {dimension_numbers = #tpu.dot_dimension_numbers<[1], [0], [0], [1], [0, 0, 1, 1], [], []>} : vector<32x4xf32>, vector<4x256xf32>, vector<32x256xf32> -> vector<32x256xf32>
    %138 = arith.addf %119, %137 : vector<32x256xf32>
    %c0_74 = arith.constant 0 : index
    %c0_75 = arith.constant 0 : index
    %c306_76 = arith.constant 306 : index
    %139 = vector.load %arg1[%c0_74, %c0_75, %c306_76] : memref<1x4x868xf32, #tpu.memory_space<vmem>>, vector<1x4x256xf32>
    %140 = vector.shape_cast %139 : vector<1x4x256xf32> to vector<4x256xf32>
    %c8 = arith.constant 8 : index
    %c0_77 = arith.constant 0 : index
    %c0_78 = arith.constant 0 : index
    %141 = vector.load %arg3[%c8, %c0_77, %c0_78] : memref<17x32x4xf32, #tpu.memory_space<vmem>>, vector<1x32x4xf32>
    %142 = vector.shape_cast %141 : vector<1x32x4xf32> to vector<32x4xf32>
    %cst_79 = arith.constant dense<0.000000e+00> : vector<32x256xf32>
    %143 = tpu.matmul %142, %140, %cst_79 {dimension_numbers = #tpu.dot_dimension_numbers<[1], [0], [0], [1], [0, 0, 1, 1], [], []>} : vector<32x4xf32>, vector<4x256xf32>, vector<32x256xf32> -> vector<32x256xf32>
    %144 = arith.addf %138, %143 : vector<32x256xf32>
    %c0_80 = arith.constant 0 : index
    %c0_81 = arith.constant 0 : index
    %c312 = arith.constant 312 : index
    %145 = vector.load %arg1[%c0_80, %c0_81, %c312] : memref<1x4x868xf32, #tpu.memory_space<vmem>>, vector<1x4x256xf32>
    %146 = vector.shape_cast %145 : vector<1x4x256xf32> to vector<4x256xf32>
    %c6_i32_82 = arith.constant 6 : i32
    %147 = vector.broadcast %c6_i32_82 : i32 to vector<1x256xi32>
    %148 = arith.addi %0, %147 : vector<1x256xi32>
    %c0_i32_83 = arith.constant 0 : i32
    %149 = vector.broadcast %c0_i32_83 : i32 to vector<1x256xi32>
    %150 = arith.cmpi sge, %148, %149 : vector<1x256xi32>
    %c6_i32_84 = arith.constant 6 : i32
    %151 = vector.broadcast %c6_i32_84 : i32 to vector<1x256xi32>
    %152 = arith.addi %0, %151 : vector<1x256xi32>
    %c16_i32_85 = arith.constant 16 : i32
    %153 = vector.broadcast %c16_i32_85 : i32 to vector<1x256xi32>
    %154 = arith.cmpi slt, %152, %153 : vector<1x256xi32>
    %155 = arith.andi %150, %154 : vector<1x256xi1>
    %cst_86 = arith.constant 0.000000e+00 : f32
    %156 = vector.shape_cast %155 : vector<1x256xi1> to vector<1x256xi1>
    %157 = vector.broadcast %156 : vector<1x256xi1> to vector<4x256xi1>
    %158 = vector.broadcast %cst_86 : f32 to vector<4x256xf32>
    %159 = arith.select %157, %146, %158 : vector<4x256xi1>, vector<4x256xf32>
    %c9 = arith.constant 9 : index
    %c0_87 = arith.constant 0 : index
    %c0_88 = arith.constant 0 : index
    %160 = vector.load %arg3[%c9, %c0_87, %c0_88] : memref<17x32x4xf32, #tpu.memory_space<vmem>>, vector<1x32x4xf32>
    %161 = vector.shape_cast %160 : vector<1x32x4xf32> to vector<32x4xf32>
    %cst_89 = arith.constant dense<0.000000e+00> : vector<32x256xf32>
    %162 = tpu.matmul %161, %159, %cst_89 {dimension_numbers = #tpu.dot_dimension_numbers<[1], [0], [0], [1], [0, 0, 1, 1], [], []>} : vector<32x4xf32>, vector<4x256xf32>, vector<32x256xf32> -> vector<32x256xf32>
    %163 = arith.addf %144, %162 : vector<32x256xf32>
    %c0_90 = arith.constant 0 : index
    %c0_91 = arith.constant 0 : index
    %c318 = arith.constant 318 : index
    %164 = vector.load %arg1[%c0_90, %c0_91, %c318] : memref<1x4x868xf32, #tpu.memory_space<vmem>>, vector<1x4x256xf32>
    %165 = vector.shape_cast %164 : vector<1x4x256xf32> to vector<4x256xf32>
    %c12_i32_92 = arith.constant 12 : i32
    %166 = vector.broadcast %c12_i32_92 : i32 to vector<1x256xi32>
    %167 = arith.addi %0, %166 : vector<1x256xi32>
    %c0_i32_93 = arith.constant 0 : i32
    %168 = vector.broadcast %c0_i32_93 : i32 to vector<1x256xi32>
    %169 = arith.cmpi sge, %167, %168 : vector<1x256xi32>
    %c12_i32_94 = arith.constant 12 : i32
    %170 = vector.broadcast %c12_i32_94 : i32 to vector<1x256xi32>
    %171 = arith.addi %0, %170 : vector<1x256xi32>
    %c16_i32_95 = arith.constant 16 : i32
    %172 = vector.broadcast %c16_i32_95 : i32 to vector<1x256xi32>
    %173 = arith.cmpi slt, %171, %172 : vector<1x256xi32>
    %174 = arith.andi %169, %173 : vector<1x256xi1>
    %cst_96 = arith.constant 0.000000e+00 : f32
    %175 = vector.shape_cast %174 : vector<1x256xi1> to vector<1x256xi1>
    %176 = vector.broadcast %175 : vector<1x256xi1> to vector<4x256xi1>
    %177 = vector.broadcast %cst_96 : f32 to vector<4x256xf32>
    %178 = arith.select %176, %165, %177 : vector<4x256xi1>, vector<4x256xf32>
    %c10 = arith.constant 10 : index
    %c0_97 = arith.constant 0 : index
    %c0_98 = arith.constant 0 : index
    %179 = vector.load %arg3[%c10, %c0_97, %c0_98] : memref<17x32x4xf32, #tpu.memory_space<vmem>>, vector<1x32x4xf32>
    %180 = vector.shape_cast %179 : vector<1x32x4xf32> to vector<32x4xf32>
    %cst_99 = arith.constant dense<0.000000e+00> : vector<32x256xf32>
    %181 = tpu.matmul %180, %178, %cst_99 {dimension_numbers = #tpu.dot_dimension_numbers<[1], [0], [0], [1], [0, 0, 1, 1], [], []>} : vector<32x4xf32>, vector<4x256xf32>, vector<32x256xf32> -> vector<32x256xf32>
    %182 = arith.addf %163, %181 : vector<32x256xf32>
    %c0_100 = arith.constant 0 : index
    %c0_101 = arith.constant 0 : index
    %c396 = arith.constant 396 : index
    %183 = vector.load %arg1[%c0_100, %c0_101, %c396] : memref<1x4x868xf32, #tpu.memory_space<vmem>>, vector<1x4x256xf32>
    %184 = vector.shape_cast %183 : vector<1x4x256xf32> to vector<4x256xf32>
    %c-6_i32_102 = arith.constant -6 : i32
    %185 = vector.broadcast %c-6_i32_102 : i32 to vector<1x256xi32>
    %186 = arith.addi %0, %185 : vector<1x256xi32>
    %c0_i32_103 = arith.constant 0 : i32
    %187 = vector.broadcast %c0_i32_103 : i32 to vector<1x256xi32>
    %188 = arith.cmpi sge, %186, %187 : vector<1x256xi32>
    %c-6_i32_104 = arith.constant -6 : i32
    %189 = vector.broadcast %c-6_i32_104 : i32 to vector<1x256xi32>
    %190 = arith.addi %0, %189 : vector<1x256xi32>
    %c16_i32_105 = arith.constant 16 : i32
    %191 = vector.broadcast %c16_i32_105 : i32 to vector<1x256xi32>
    %192 = arith.cmpi slt, %190, %191 : vector<1x256xi32>
    %193 = arith.andi %188, %192 : vector<1x256xi1>
    %cst_106 = arith.constant 0.000000e+00 : f32
    %194 = vector.shape_cast %193 : vector<1x256xi1> to vector<1x256xi1>
    %195 = vector.broadcast %194 : vector<1x256xi1> to vector<4x256xi1>
    %196 = vector.broadcast %cst_106 : f32 to vector<4x256xf32>
    %197 = arith.select %195, %184, %196 : vector<4x256xi1>, vector<4x256xf32>
    %c11 = arith.constant 11 : index
    %c0_107 = arith.constant 0 : index
    %c0_108 = arith.constant 0 : index
    %198 = vector.load %arg3[%c11, %c0_107, %c0_108] : memref<17x32x4xf32, #tpu.memory_space<vmem>>, vector<1x32x4xf32>
    %199 = vector.shape_cast %198 : vector<1x32x4xf32> to vector<32x4xf32>
    %cst_109 = arith.constant dense<0.000000e+00> : vector<32x256xf32>
    %200 = tpu.matmul %199, %197, %cst_109 {dimension_numbers = #tpu.dot_dimension_numbers<[1], [0], [0], [1], [0, 0, 1, 1], [], []>} : vector<32x4xf32>, vector<4x256xf32>, vector<32x256xf32> -> vector<32x256xf32>
    %201 = arith.addf %182, %200 : vector<32x256xf32>
    %c0_110 = arith.constant 0 : index
    %c0_111 = arith.constant 0 : index
    %c402 = arith.constant 402 : index
    %202 = vector.load %arg1[%c0_110, %c0_111, %c402] : memref<1x4x868xf32, #tpu.memory_space<vmem>>, vector<1x4x256xf32>
    %203 = vector.shape_cast %202 : vector<1x4x256xf32> to vector<4x256xf32>
    %c12 = arith.constant 12 : index
    %c0_112 = arith.constant 0 : index
    %c0_113 = arith.constant 0 : index
    %204 = vector.load %arg3[%c12, %c0_112, %c0_113] : memref<17x32x4xf32, #tpu.memory_space<vmem>>, vector<1x32x4xf32>
    %205 = vector.shape_cast %204 : vector<1x32x4xf32> to vector<32x4xf32>
    %cst_114 = arith.constant dense<0.000000e+00> : vector<32x256xf32>
    %206 = tpu.matmul %205, %203, %cst_114 {dimension_numbers = #tpu.dot_dimension_numbers<[1], [0], [0], [1], [0, 0, 1, 1], [], []>} : vector<32x4xf32>, vector<4x256xf32>, vector<32x256xf32> -> vector<32x256xf32>
    %207 = arith.addf %201, %206 : vector<32x256xf32>
    %c0_115 = arith.constant 0 : index
    %c0_116 = arith.constant 0 : index
    %c408 = arith.constant 408 : index
    %208 = vector.load %arg1[%c0_115, %c0_116, %c408] : memref<1x4x868xf32, #tpu.memory_space<vmem>>, vector<1x4x256xf32>
    %209 = vector.shape_cast %208 : vector<1x4x256xf32> to vector<4x256xf32>
    %c6_i32_117 = arith.constant 6 : i32
    %210 = vector.broadcast %c6_i32_117 : i32 to vector<1x256xi32>
    %211 = arith.addi %0, %210 : vector<1x256xi32>
    %c0_i32_118 = arith.constant 0 : i32
    %212 = vector.broadcast %c0_i32_118 : i32 to vector<1x256xi32>
    %213 = arith.cmpi sge, %211, %212 : vector<1x256xi32>
    %c6_i32_119 = arith.constant 6 : i32
    %214 = vector.broadcast %c6_i32_119 : i32 to vector<1x256xi32>
    %215 = arith.addi %0, %214 : vector<1x256xi32>
    %c16_i32_120 = arith.constant 16 : i32
    %216 = vector.broadcast %c16_i32_120 : i32 to vector<1x256xi32>
    %217 = arith.cmpi slt, %215, %216 : vector<1x256xi32>
    %218 = arith.andi %213, %217 : vector<1x256xi1>
    %cst_121 = arith.constant 0.000000e+00 : f32
    %219 = vector.shape_cast %218 : vector<1x256xi1> to vector<1x256xi1>
    %220 = vector.broadcast %219 : vector<1x256xi1> to vector<4x256xi1>
    %221 = vector.broadcast %cst_121 : f32 to vector<4x256xf32>
    %222 = arith.select %220, %209, %221 : vector<4x256xi1>, vector<4x256xf32>
    %c13 = arith.constant 13 : index
    %c0_122 = arith.constant 0 : index
    %c0_123 = arith.constant 0 : index
    %223 = vector.load %arg3[%c13, %c0_122, %c0_123] : memref<17x32x4xf32, #tpu.memory_space<vmem>>, vector<1x32x4xf32>
    %224 = vector.shape_cast %223 : vector<1x32x4xf32> to vector<32x4xf32>
    %cst_124 = arith.constant dense<0.000000e+00> : vector<32x256xf32>
    %225 = tpu.matmul %224, %222, %cst_124 {dimension_numbers = #tpu.dot_dimension_numbers<[1], [0], [0], [1], [0, 0, 1, 1], [], []>} : vector<32x4xf32>, vector<4x256xf32>, vector<32x256xf32> -> vector<32x256xf32>
    %226 = arith.addf %207, %225 : vector<32x256xf32>
    %c0_125 = arith.constant 0 : index
    %c0_126 = arith.constant 0 : index
    %c486 = arith.constant 486 : index
    %227 = vector.load %arg1[%c0_125, %c0_126, %c486] : memref<1x4x868xf32, #tpu.memory_space<vmem>>, vector<1x4x256xf32>
    %228 = vector.shape_cast %227 : vector<1x4x256xf32> to vector<4x256xf32>
    %c-12_i32_127 = arith.constant -12 : i32
    %229 = vector.broadcast %c-12_i32_127 : i32 to vector<1x256xi32>
    %230 = arith.addi %0, %229 : vector<1x256xi32>
    %c0_i32_128 = arith.constant 0 : i32
    %231 = vector.broadcast %c0_i32_128 : i32 to vector<1x256xi32>
    %232 = arith.cmpi sge, %230, %231 : vector<1x256xi32>
    %c-12_i32_129 = arith.constant -12 : i32
    %233 = vector.broadcast %c-12_i32_129 : i32 to vector<1x256xi32>
    %234 = arith.addi %0, %233 : vector<1x256xi32>
    %c16_i32_130 = arith.constant 16 : i32
    %235 = vector.broadcast %c16_i32_130 : i32 to vector<1x256xi32>
    %236 = arith.cmpi slt, %234, %235 : vector<1x256xi32>
    %237 = arith.andi %232, %236 : vector<1x256xi1>
    %cst_131 = arith.constant 0.000000e+00 : f32
    %238 = vector.shape_cast %237 : vector<1x256xi1> to vector<1x256xi1>
    %239 = vector.broadcast %238 : vector<1x256xi1> to vector<4x256xi1>
    %240 = vector.broadcast %cst_131 : f32 to vector<4x256xf32>
    %241 = arith.select %239, %228, %240 : vector<4x256xi1>, vector<4x256xf32>
    %c14 = arith.constant 14 : index
    %c0_132 = arith.constant 0 : index
    %c0_133 = arith.constant 0 : index
    %242 = vector.load %arg3[%c14, %c0_132, %c0_133] : memref<17x32x4xf32, #tpu.memory_space<vmem>>, vector<1x32x4xf32>
    %243 = vector.shape_cast %242 : vector<1x32x4xf32> to vector<32x4xf32>
    %cst_134 = arith.constant dense<0.000000e+00> : vector<32x256xf32>
    %244 = tpu.matmul %243, %241, %cst_134 {dimension_numbers = #tpu.dot_dimension_numbers<[1], [0], [0], [1], [0, 0, 1, 1], [], []>} : vector<32x4xf32>, vector<4x256xf32>, vector<32x256xf32> -> vector<32x256xf32>
    %245 = arith.addf %226, %244 : vector<32x256xf32>
    %c0_135 = arith.constant 0 : index
    %c0_136 = arith.constant 0 : index
    %c498 = arith.constant 498 : index
    %246 = vector.load %arg1[%c0_135, %c0_136, %c498] : memref<1x4x868xf32, #tpu.memory_space<vmem>>, vector<1x4x256xf32>
    %247 = vector.shape_cast %246 : vector<1x4x256xf32> to vector<4x256xf32>
    %c15 = arith.constant 15 : index
    %c0_137 = arith.constant 0 : index
    %c0_138 = arith.constant 0 : index
    %248 = vector.load %arg3[%c15, %c0_137, %c0_138] : memref<17x32x4xf32, #tpu.memory_space<vmem>>, vector<1x32x4xf32>
    %249 = vector.shape_cast %248 : vector<1x32x4xf32> to vector<32x4xf32>
    %cst_139 = arith.constant dense<0.000000e+00> : vector<32x256xf32>
    %250 = tpu.matmul %249, %247, %cst_139 {dimension_numbers = #tpu.dot_dimension_numbers<[1], [0], [0], [1], [0, 0, 1, 1], [], []>} : vector<32x4xf32>, vector<4x256xf32>, vector<32x256xf32> -> vector<32x256xf32>
    %251 = arith.addf %245, %250 : vector<32x256xf32>
    %c0_140 = arith.constant 0 : index
    %c0_141 = arith.constant 0 : index
    %c510 = arith.constant 510 : index
    %252 = vector.load %arg1[%c0_140, %c0_141, %c510] : memref<1x4x868xf32, #tpu.memory_space<vmem>>, vector<1x4x256xf32>
    %253 = vector.shape_cast %252 : vector<1x4x256xf32> to vector<4x256xf32>
    %c12_i32_142 = arith.constant 12 : i32
    %254 = vector.broadcast %c12_i32_142 : i32 to vector<1x256xi32>
    %255 = arith.addi %0, %254 : vector<1x256xi32>
    %c0_i32_143 = arith.constant 0 : i32
    %256 = vector.broadcast %c0_i32_143 : i32 to vector<1x256xi32>
    %257 = arith.cmpi sge, %255, %256 : vector<1x256xi32>
    %c12_i32_144 = arith.constant 12 : i32
    %258 = vector.broadcast %c12_i32_144 : i32 to vector<1x256xi32>
    %259 = arith.addi %0, %258 : vector<1x256xi32>
    %c16_i32_145 = arith.constant 16 : i32
    %260 = vector.broadcast %c16_i32_145 : i32 to vector<1x256xi32>
    %261 = arith.cmpi slt, %259, %260 : vector<1x256xi32>
    %262 = arith.andi %257, %261 : vector<1x256xi1>
    %cst_146 = arith.constant 0.000000e+00 : f32
    %263 = vector.shape_cast %262 : vector<1x256xi1> to vector<1x256xi1>
    %264 = vector.broadcast %263 : vector<1x256xi1> to vector<4x256xi1>
    %265 = vector.broadcast %cst_146 : f32 to vector<4x256xf32>
    %266 = arith.select %264, %253, %265 : vector<4x256xi1>, vector<4x256xf32>
    %c16 = arith.constant 16 : index
    %c0_147 = arith.constant 0 : index
    %c0_148 = arith.constant 0 : index
    %267 = vector.load %arg3[%c16, %c0_147, %c0_148] : memref<17x32x4xf32, #tpu.memory_space<vmem>>, vector<1x32x4xf32>
    %268 = vector.shape_cast %267 : vector<1x32x4xf32> to vector<32x4xf32>
    %cst_149 = arith.constant dense<0.000000e+00> : vector<32x256xf32>
    %269 = tpu.matmul %268, %266, %cst_149 {dimension_numbers = #tpu.dot_dimension_numbers<[1], [0], [0], [1], [0, 0, 1, 1], [], []>} : vector<32x4xf32>, vector<4x256xf32>, vector<32x256xf32> -> vector<32x256xf32>
    %270 = arith.addf %251, %269 : vector<32x256xf32>
    %c0_150 = arith.constant 0 : index
    %c0_151 = arith.constant 0 : index
    %c0_152 = arith.constant 0 : index
    %271 = vector.load %arg6[%c0_150, %c0_151, %c0_152] : memref<1x32x256xf32, #tpu.memory_space<vmem>>, vector<1x32x256xf32>
    %272 = vector.shape_cast %271 : vector<1x32x256xf32> to vector<32x256xf32>
    %273 = vector.shape_cast %270 : vector<32x256xf32> to vector<1x32x256xf32>
    tpu.vector_store %arg6[%c0_150, %c0_151, %c0_152], %273 {strides = array<i32>} : memref<1x32x256xf32, #tpu.memory_space<vmem>>, vector<1x32x256xf32>,
    return
  }
  func.func @transform_0(%arg0: i32) -> (i32, i32, i32) {
    %c0_i32 = arith.constant 0 : i32
    %c0_i32_0 = arith.constant 0 : i32
    %c0_i32_1 = arith.constant 0 : i32
    return %arg0, %c0_i32, %c0_i32_0 : i32, i32, i32
  }
  func.func @transform_1(%arg0: i32) -> (i32, i32) {
    %c0_i32 = arith.constant 0 : i32
    %c0_i32_0 = arith.constant 0 : i32
    %c0_i32_1 = arith.constant 0 : i32
    return %c0_i32, %c0_i32_0 : i32, i32
  }
  func.func @transform_2(%arg0: i32) -> (i32, i32, i32) {
    %c0_i32 = arith.constant 0 : i32
    %c0_i32_0 = arith.constant 0 : i32
    %c0_i32_1 = arith.constant 0 : i32
    %c0_i32_2 = arith.constant 0 : i32
    return %c0_i32, %c0_i32_0, %c0_i32_1 : i32, i32, i32
  }
  func.func @transform_3(%arg0: i32) -> (i32, i32) {
    %c0_i32 = arith.constant 0 : i32
    %c0_i32_0 = arith.constant 0 : i32
    %c0_i32_1 = arith.constant 0 : i32
    return %c0_i32, %c0_i32_0 : i32, i32
  }
  func.func @transform_4(%arg0: i32) -> (i32, i32) {
    %c0_i32 = arith.constant 0 : i32
    %c0_i32_0 = arith.constant 0 : i32
    %c0_i32_1 = arith.constant 0 : i32
    return %c0_i32, %c0_i32_0 : i32, i32
  }
  func.func @transform_5(%arg0: i32) -> (i32, i32, i32) {
    %c0_i32 = arith.constant 0 : i32
    %c0_i32_0 = arith.constant 0 : i32
    %c0_i32_1 = arith.constant 0 : i32
    return %arg0, %c0_i32, %c0_i32_0 : i32, i32, i32
  }
}

</mosaic_0001>

<bundles_post_ra>
// kernel: tpu_custom_call.1
= control target key start
LH: loop header
LB: loop body
LE: loop exit
PB: predicated region body
PF: predicated region fallthrough
CT: control target
= control target key end

     0   :  { %10 = vsyncpa [#allocation3], 0  ;;  %s3693_s0 = inlined_call_operand.vmem [shape: f32[2,4,868], index: 0, kind: input, shape index: {}]   ;;  %s3694_s1 = inlined_call_operand.vmem [shape: s32[1,256], index: 1, kind: input, shape index: {}]   ;;  %s3695_s2 = inlined_call_operand.vmem [shape: f32[17,32,4], index: 2, kind: input, shape index: {}]   ;;  %s3696_s3 = inlined_call_operand.vmem [shape: f32[32,4], index: 3, kind: input, shape index: {}]   ;;  %s3697_s4 = inlined_call_operand.vmem [shape: f32[32,1], index: 4, kind: input, shape index: {}]   ;;  %s3698_s5 = inlined_call_operand.hbm [shape: f32[2,32,256], index: 5, kind: output, shape index: {}]  }
   0x1   :  { %12 = vsyncpa [#allocation3 + $0x1], 0  ;;  %s2737_s18 = smov 0   ;;  %s2739_s19 = smov 0  }
   0x2   :  { %s2741_s20 = smov 0   ;;  %s2743_s21 = smov 0  }
   0x3 LB: > { %s2758_s22 = sadd.s32 4294967295, %s2688_s21   ;;  %s2312_s23 = sadd.s32 4294967294, %s2688_s21   ;;  %s2688_s21 = sphi %s2743_s21, %s3726_s21   ;;  %s2684_s20 = sphi %s2741_s20, %s3725_s20   ;;  %s2680_s19 = sphi %s2739_s19, %s3724_s19   ;;  %s2676_s18 = sphi %s2737_s18, %s3723_s18  }
   0x4   : > { %s2762_s24 = sadd.s32 1, %s2688_s21   ;;  %s135_s25 = sadd.s32 1, %s2684_s20 }
   0x5   : > { %s132_s26 = ssub.s32 %s2688_s21, %s2762_s24  ;;  %p145_p0 = scmp.ne.s32.totalorder %s2684_s20, %s2680_s19 }
   0x6   : > { %p133_p1 = scmp.eq.s32.totalorder %s132_s26, 0  ;;  %p146_p2 = scmp.eq.s32.totalorder %s2758_s22, 1 }
   0x7   : > { %p151_p3 = scmp.ne.s32.totalorder %s2680_s19, %s2676_s18  ;;  %p152_p4 = scmp.eq.s32.totalorder %s2312_s23, 1 }
   0x8   : > { %s2773_s27 = scalar_select %p133_p1, %s2684_s20, %s135_s25  }
   0x9   : > { %p2775_p5 = por %p146_p2, %p145_p0  ;;  %p2779_p6 = por %p152_p4, %p151_p3 }
   0xa   : > { %p2315_p7 = scmp.ge.s32.totalorder %s2688_s21, 1  ;;  %p190_p8 = scmp.lt.s32.totalorder %s2688_s21, 3 }
   0xc   : > { %p191_p9 = pnand %p2315_p7, %p190_p8 }
   0xd   : > { %p218_p10 = scmp.lt.s32.totalorder (!%p191_p9), %s2758_s22, 1  ;;  %s2690_s10 = smov (!%p191_p9), 78  }
   0xe   : > { %194 = sbr.rel (%p191_p9) target bundleno = 691 (0x2b3), region = 40  ;;  %s2691_s11 = smov (!%p191_p9), 26  }
   0xf   : > { %s2692_s12 = smov (!%p191_p9), 14   ;;  %s2693_s13 = smov (!%p191_p9), 2  }
  0x10   : > { %s2694_s14 = smov (!%p191_p9), 52   ;;  %s2695_s15 = smov (!%p191_p9), 46  }
  0x11   : > { %s2696_s16 = smov (!%p191_p9), 40   ;;  %s2697_s17 = smov (!%p191_p9), 90  }
  0x12   : > { %s2699_s26 = smov (!%p191_p9), 84   ;;  %s2704_s23 = smov (!%p191_p9), 104  }
  0x13   : > { %s219_s30 = scalar_select %p218_p10, %s2758_s22, 1  ;;  %vm240_vm0 = vcmask 637952   ;;  %vm245_vm1 = vcmask 1043456   ;;  %v2832_v47 = vld [vmem:[%s3694_s1] sm:$0x3]  ;;  %v2698_v49 = vmov 0  }
  0x14   : > { %v327_v48 = vadd.s32 4294967284, %v2832_v47  ;;  %2623 = vset.pattern.permute.xlu2 %v2698_v49  ;;  %2624 = vset.pattern.permute.xlu1 %v2698_v49  ;;  %vm350_vm4 = vcmask 211968   ;;  %vm260_vm8 = vcmask 31744   ;;  %vm3700_vm12 = vcmask 15360  }
  0x15   : > { %s2566_s6 = smul.u32 28, %s219_s30  ;;  %2625 = vset.pattern.permute.xlu0 %v2698_v49  ;;  %s2700_s30 = smov 72  }
  0x16   : > { %vm328_vm2 = vcmp.ge.s32.totalorder %v327_v48, 0  ;;  %vm329_vm3 = vcmp.lt.s32.totalorder %v327_v48, 16 }
  0x17   : > { %s2790_s9 = scalar_lea.vmem %s3693_s0, %s2566_s6  ;;  %vm330_vm5 = vmand %vm328_vm2, %vm329_vm3  ;;  %s2701_s6 = smov 66  }
  0x18   : > { %v2793_v0 = vld [vmem:[%s2790_s9 + $0x8] sm:$0xff]  ;;  %v2796_v1 = vld [vmem:[%s2790_s9 + $0x10] sm:$0xf]  ;;  %v325_v2 = vld [vmem:[%s2790_s9] sm:$0xff]  ;;  %v331_v54 = vsel %vm330_vm5, 1, %v2698_v49  ;;  %vm814_vm5 = vcmask 375808  }
  0x19   : > { %228 = vst [vmem:[#allocation1] ss:$2 sm:$0xff] %v2793_v0  ;;  %v326_v9 = vld [vmem:[%s2790_s9 + $0x8] sm:$0xf]  ;;  %v673_v18 = vld [vmem:[%s2790_s9 + $0xc] sm:$0xf] }
  0x1a   : > { %230 = vst [vmem:[#allocation1 + $0x10] ss:$2 sm:$0xff] %v2796_v1  ;;  %v446_v11 = vld [vmem:[%s2790_s9 + $0x8] sm:$0xf]  ;;  %v794_v20 = vld [vmem:[%s2790_s9 + $0xc] sm:$0xf] }
  0x1b   : > { %v552_v13 = vld [vmem:[%s2790_s9 + $0x8] sm:$0xf]  ;;  %v900_v26 = vld [vmem:[%s2790_s9 + $0xc] sm:$0xf]  ;;  %v1021_v39 = vld [vmem:[%s2790_s9 + $0x10] sm:$0xf] }
  0x1c   : > { %v672_v15 = vld [vmem:[%s2790_s9 + $0x4] sm:$0xff]  ;;  %v1133_v43 = vld [vmem:[%s2790_s9 + $0x10] sm:$0xf]  ;;  %v332_v55 = vperm.slane %v331_v54, 0  ;;  %v333_v59 = vperm.slane %v331_v54, 1 }
  0x1d   : > { %v254_v54 = vld [vmem:[%s3696_s3 + $0x10] sm:$0xff] }
  0x1e   : > { %vm2843_vm6 = vcmp.eq.s32.totalorder %v332_v55, 1  ;;  %vm2854_vm7 = vcmp.eq.s32.totalorder %v333_v59, 1  ;;  %v357_v55 = vld [vmem:[%s3695_s2] sm:$0xff] }
  0x20   : > { %v231_v3 = vld.sshfl [vmem:[#allocation1] sm:$0xff pattern:$0x75316420]  ;;  %v232_v4 = vld.sshfl [vmem:[#allocation1 + $0x8] sm:$0xff pattern:$0x75316420] }
  0x21   : > { %234 = vrot.lane.b32.xlu0 %v231_v3, %s2690_s10  ;;  %v233_v5 = vld.sshfl [vmem:[#allocation1 + $0x10] sm:$0xff pattern:$0x75316420]  ;;  %338 = vst [vmem:[#allocation1] ss:$2 sm:$0xff] %v325_v2 }
  0x22   : > { %238 = vrot.lane.b32.xlu1 %v233_v5, %s2690_s10  ;;  %340 = vst [vmem:[#allocation1 + $0x10] ss:$2 sm:$0xff] %v326_v9 }
  0x28   : > { %v341_v6 = vld.sshfl [vmem:[#allocation1] sm:$0xff pattern:$0x75316420]  ;;  %v342_v7 = vld.sshfl [vmem:[#allocation1 + $0x8] sm:$0xff pattern:$0x75316420] }
  0x29   : > { %236 = vrot.lane.b32.xlu0 %v232_v4, %s2690_s10  ;;  %346 = vrot.lane.b32.xlu2 %v342_v7, %s2691_s11  ;;  %454 = vst [vmem:[#allocation1] ss:$2 sm:$0xff] %v325_v2  ;;  %v343_v10 = vld.sshfl [vmem:[#allocation1 + $0x10] sm:$0xff pattern:$0x75316420]  ;;  %v358_v7 = vld [vmem:[%s3695_s2 + $0x8] sm:$0xff] }
  0x2a   : > { %456 = vst [vmem:[#allocation1 + $0x10] ss:$2 sm:$0xff] %v446_v11 }
  0x30   : > { %v458_v8 = vld.sshfl [vmem:[#allocation1 + $0x8] sm:$0xff pattern:$0x75316420]  ;;  %v457_v12 = vld.sshfl [vmem:[#allocation1] sm:$0xff pattern:$0x75316420] }
  0x31   : > { %344 = vrot.lane.b32.xlu0 %v341_v6, %s2691_s11  ;;  %348 = vrot.lane.b32.xlu2 %v343_v10, %s2691_s11  ;;  %564 = vst [vmem:[#allocation1] ss:$2 sm:$0xff] %v325_v2  ;;  %v459_v14 = vld.sshfl [vmem:[#allocation1 + $0x10] sm:$0xff pattern:$0x75316420] }
  0x32   : > { %566 = vst [vmem:[#allocation1 + $0x10] ss:$2 sm:$0xff] %v552_v13  ;;  %v1346_v10 = vld [vmem:[%s2790_s9 + $0x10] sm:$0xf] }
  0x38   : > { %v567_v16 = vld.sshfl [vmem:[#allocation1] sm:$0xff pattern:$0x75316420]  ;;  %v568_v17 = vld.sshfl [vmem:[#allocation1 + $0x8] sm:$0xff pattern:$0x75316420] }
  0x39   : > { %462 = vrot.lane.b32.xlu0 %v458_v8, %s2692_s12  ;;  %460 = vrot.lane.b32.xlu2 %v457_v12, %s2692_s12  ;;  %685 = vst [vmem:[#allocation1] ss:$2 sm:$0xff] %v672_v15  ;;  %v569_v19 = vld.sshfl [vmem:[#allocation1 + $0x10] sm:$0xff pattern:$0x75316420] }
  0x3a   : > { %687 = vst [vmem:[#allocation1 + $0x10] ss:$2 sm:$0xff] %v673_v18  ;;  %v359_v12 = vld [vmem:[%s3695_s2 + $0x10] sm:$0xff] }
  0x40   : > { %v689_v24 = vld.sshfl [vmem:[#allocation1 + $0x8] sm:$0xff pattern:$0x75316420]  ;;  %v688_v25 = vld.sshfl [vmem:[#allocation1] sm:$0xff pattern:$0x75316420] }
  0x41   : > { %572 = vrot.lane.b32.xlu2 %v568_v17, %s2693_s13  ;;  %574 = vrot.lane.b32.xlu0 %v569_v19, %s2693_s13  ;;  %v690_v22 = vld.sshfl [vmem:[#allocation1 + $0x10] sm:$0xff pattern:$0x75316420]  ;;  %802 = vst [vmem:[#allocation1] ss:$2 sm:$0xff] %v672_v15  ;;  %v360_v19 = vld [vmem:[%s3695_s2 + $0x18] sm:$0xff] }
  0x42   : > { %804 = vst [vmem:[#allocation1 + $0x10] ss:$2 sm:$0xff] %v794_v20 }
  0x48   : > { %v805_v34 = vld.sshfl [vmem:[#allocation1] sm:$0xff pattern:$0x75316420]  ;;  %v806_v35 = vld.sshfl [vmem:[#allocation1 + $0x8] sm:$0xff pattern:$0x75316420] }
  0x49   : > { %464 = vrot.lane.b32.xlu2 %v459_v14, %s2692_s12  ;;  %570 = vrot.lane.b32.xlu0 %v567_v16, %s2693_s13  ;;  %v807_v30 = vld.sshfl [vmem:[#allocation1 + $0x10] sm:$0xff pattern:$0x75316420]  ;;  %912 = vst [vmem:[#allocation1] ss:$2 sm:$0xff] %v672_v15 }
  0x4a   : > { %914 = vst [vmem:[#allocation1 + $0x10] ss:$2 sm:$0xff] %v900_v26 }
  0x50   : > { %v915_v37 = vld.sshfl [vmem:[#allocation1] sm:$0xff pattern:$0x75316420]  ;;  %v916_v38 = vld.sshfl [vmem:[#allocation1 + $0x8] sm:$0xff pattern:$0x75316420] }
  0x51   : > { %691 = vrot.lane.b32.xlu2 %v688_v25, %s2694_s14  ;;  %693 = vrot.lane.b32.xlu0 %v689_v24, %s2694_s14  ;;  %v917_v36 = vld.sshfl [vmem:[#allocation1 + $0x10] sm:$0xff pattern:$0x75316420]  ;;  %1024 = vst [vmem:[#allocation1] ss:$2 sm:$0xff] %v2793_v0 }
  0x52   : > { %1026 = vst [vmem:[#allocation1 + $0x10] ss:$2 sm:$0xff] %v1021_v39  ;;  %v2460_v39 = vld [vmem:[%s3695_s2 + $0x148] sm:$0xff] }
  0x58   : > { %v1028_v40 = vld.sshfl [vmem:[#allocation1 + $0x8] sm:$0xff pattern:$0x75316420]  ;;  %v1027_v41 = vld.sshfl [vmem:[#allocation1] sm:$0xff pattern:$0x75316420] }
  0x59   : > { %810 = vrot.lane.b32.xlu2 %v806_v35, %s2695_s15  ;;  %695 = vrot.lane.b32.xlu0 %v690_v22, %s2694_s14  ;;  %1136 = vst [vmem:[#allocation1] ss:$2 sm:$0xff] %v2793_v0  ;;  %v1029_v42 = vld.sshfl [vmem:[#allocation1 + $0x10] sm:$0xff pattern:$0x75316420]  ;;  %s2562_s14 = sshll.u32 %s2758_s22, 6 }
  0x5a   : > { %1138 = vst [vmem:[#allocation1 + $0x10] ss:$2 sm:$0xff] %v1133_v43  ;;  %v2925_v35 = vld [vmem:[%s2790_s9 + $0xc] sm:$0xff] }
  0x5b   : > { %v253_v43 = vld [vmem:[%s3696_s3 + $0x8] sm:$0xff] }
  0x60   : > { %v1140_v44 = vld.sshfl [vmem:[#allocation1 + $0x8] sm:$0xff pattern:$0x75316420]  ;;  %v1139_v45 = vld.sshfl [vmem:[#allocation1] sm:$0xff pattern:$0x75316420] }
  0x61   : > { %808 = vrot.lane.b32.xlu2 %v805_v34, %s2695_s15  ;;  %918 = vrot.lane.b32.xlu0 %v915_v37, %s2696_s16  ;;  %1249 = vst [vmem:[#allocation1] ss:$2 sm:$0xff] %v2793_v0  ;;  %v1141_v46 = vld.sshfl [vmem:[#allocation1 + $0x10] sm:$0xff pattern:$0x75316420]  ;;  %v2348_v37 = vld [vmem:[%s3695_s2 + $0x48] sm:$0xff] }
  0x62   : > { %1251 = vst [vmem:[#allocation1 + $0x10] ss:$2 sm:$0xff] %v2796_v1 }
  0x68   : > { %v1253_v50 = vld.sshfl [vmem:[#allocation1 + $0x8] sm:$0xff pattern:$0x75316420]  ;;  %v1252_v51 = vld.sshfl [vmem:[#allocation1] sm:$0xff pattern:$0x75316420] }
  0x69   : > { %920 = vrot.lane.b32.xlu2 %v916_v38, %s2696_s16  ;;  %1032 = vrot.lane.b32.xlu0 %v1028_v40, %s2697_s17  ;;  %1349 = vst [vmem:[#allocation1] ss:$2 sm:$0xff] %v2793_v0  ;;  %v1254_v8 = vld.sshfl [vmem:[#allocation1 + $0x10] sm:$0xff pattern:$0x75316420] }
  0x6a   : > { %1351 = vst [vmem:[#allocation1 + $0x10] ss:$2 sm:$0xff] %v1346_v10 }
  0x70   : > { %v1353_v2 = vld.sshfl [vmem:[#allocation1 + $0x8] sm:$0xff pattern:$0x75316420]  ;;  %v1352_v3 = vld.sshfl [vmem:[#allocation1] sm:$0xff pattern:$0x75316420] }
  0x71   : > { %1034 = vrot.lane.b32.xlu2 %v1029_v42, %s2697_s17  ;;  %1030 = vrot.lane.b32.xlu0 %v1027_v41, %s2697_s17  ;;  %1461 = vst [vmem:[#allocation1] ss:$2 sm:$0xff] %v2793_v0  ;;  %v553_v0 = vadd.s32 12, %v2832_v47  ;;  %v252_v42 = vld [vmem:[%s3696_s3] sm:$0xff] }
  0x73   : > { %vm554_vm9 = vcmp.ge.s32.totalorder %v553_v0, 0  ;;  %vm555_vm10 = vcmp.lt.s32.totalorder %v553_v0, 16 }
  0x74   : > { %vm556_vm11 = vmand %vm554_vm9, %vm555_vm10  ;;  %vm697_vm9 = vcmask 424960   ;;  %vm3699_vm10 = vcmask 113664  }
  0x75   : > { %v557_v14 = vsel %vm556_vm11, 1, %v2698_v49 }
  0x76   : > { %v559_v15 = vperm.slane %v557_v14, 1  ;;  %v558_v22 = vperm.slane %v557_v14, 0 }
  0x78   : > { %v1465_v5 = vld.sshfl [vmem:[#allocation1 + $0x8] sm:$0xff pattern:$0x75316420]  ;;  %v1464_v11 = vld.sshfl [vmem:[#allocation1] sm:$0xff pattern:$0x75316420] }
  0x79   : > { %1142 = vrot.lane.b32.xlu2 %v1139_v45, %s2699_s26  ;;  %1257 = vrot.lane.b32.xlu0 %v1253_v50, %s2690_s10  ;;  %vm2890_vm13 = vcmp.eq.s32.totalorder %v559_v15, 1  ;;  %vm2907_vm14 = vcmp.eq.s32.totalorder %v558_v22, 1  ;;  %1573 = vst [vmem:[#allocation1] ss:$2 sm:$0xff] %v2925_v35  ;;  %v2333_v15 = vld [vmem:[%s3695_s2 + $0x20] sm:$0xff] }
  0x80   : > { %v1577_v48 = vld.sshfl [vmem:[#allocation1 + $0x8] sm:$0xff pattern:$0x75316420]  ;;  %v1576_v50 = vld.sshfl [vmem:[#allocation1] sm:$0xff pattern:$0x75316420] }
  0x81   : > { %1255 = vrot.lane.b32.xlu0 %v1252_v51, %s2690_s10  ;;  %1259 = vrot.lane.b32.xlu2 %v1254_v8, %s2690_s10  ;;  %1690 = vst [vmem:[#allocation1] ss:$2 sm:$0xff] %v2925_v35  ;;  %s2246_s10 = scalar_lea.hbm %s3698_s5, %s2562_s14 }
  0x83   : > { %v347_v53 = vpop.permute.xlu2 %346 }
  0x88   : > { %v1694_v59 = vld.sshfl [vmem:[#allocation1 + $0x8] sm:$0xff pattern:$0x75316420] }
  0x89   : > { %1469 = vrot.lane.b32.xlu0 %v1465_v5, %s2701_s6  ;;  %1355 = vrot.lane.b32.xlu2 %v1352_v3, %s2700_s30 }
  0x8b   : > { %v349_v61 = vpop.permute.xlu2 %348 }
  0x8c   : > { %v352_v62 = vsel %vm350_vm4, %v347_v53, %v349_v61  ;;  %v1693_v61 = vld.sshfl [vmem:[#allocation1] sm:$0xff pattern:$0x75316420] }
  0x8d   : > { %v2861_v63 = vsel %vm2854_vm7, %v352_v62, 0.0  ;;  %1791 = vst [vmem:[#allocation1] ss:$2 sm:$0xff] %v2925_v35 }
  0x8e   : > { %2565 = vmatpush.msk.msra.mxu2 %vm245_vm1, %v2861_v63 }
  0x8f   : > { %2330 = vmatmul.msk.f32.vlgmr.msra.gmra.mxu2 %vm260_vm8, %v358_v7 }
  0x91   : > { %1467 = vrot.lane.b32.xlu0 %v1464_v11, %s2701_s6  ;;  %v2375_v11 = vld [vmem:[%s3695_s2 + $0x80] sm:$0xff] }
  0x93   : > { %v235_v21 = vpop.permute.xlu0 %234  ;;  %v2865_v1 = vpop.permute.xlu2 %460 }
  0x94   : > { %v239_v23 = vpop.permute.xlu1 %238  ;;  %v1794_v22 = vld.sshfl [vmem:[#allocation1] sm:$0xff pattern:$0x75316420] }
  0x97   : > { %2331 = vmatmul.msk.f32.gmra.mxu2 %vm260_vm8, %v359_v12 }
  0x9b   : > { %v237_v27 = vpop.permute.xlu0 %236  ;;  %v573_v4 = vpop.permute.xlu2 %572 }
  0x9c   : > { %v241_v28 = vsel %vm240_vm0, %v235_v21, %v237_v27  ;;  %v242_v29 = vsel %vm240_vm0, %v237_v27, %v239_v23  ;;  %v1354_v21 = vld.sshfl [vmem:[#allocation1 + $0x10] sm:$0xff pattern:$0x75316420]  ;;  %v674_v23 = vadd.s32 4294967290, %v2832_v47 }
  0x9d   : > { %v246_v31 = vsel %vm245_vm1, %v241_v28, 0.0  ;;  %v247_v32 = vsel %vm245_vm1, %v242_v29, 0.0  ;;  %v2347_v28 = vld [vmem:[%s3695_s2 + $0x40] sm:$0xff] }
  0x9e   : > { %v248_v33 = vadd.f32 %v247_v32, %v246_v31  ;;  %vm675_vm15 = vcmp.ge.s32.totalorder %v674_v23, 0  ;;  %vm676_vm2 = vcmp.lt.s32.totalorder %v674_v23, 16 }
  0x9f   : > { %2332 = vmatmul.msk.f32.gmra.mxu2 %vm260_vm8, %v360_v19  ;;  %vm677_vm3 = vmand %vm675_vm15, %vm676_vm2 }
  0xa0   : > { %249 = vadd.xlane.f32.xlu1 %v248_v33 }
  0xa3   : > { %v345_v52 = vpop.permute.xlu0 %344  ;;  %v2870_v6 = vpop.permute.xlu2 %464 }
  0xa4   : > { %v351_v56 = vsel %vm350_vm4, %v345_v52, %v347_v53  ;;  %v2349_v52 = vld [vmem:[%s3695_s2 + $0x50] sm:$0xff] }
  0xa5   : > { %v2849_v58 = vsel %vm2843_vm6, %v351_v56, 0.0  ;;  %v1570_v53 = vld [vmem:[%s2790_s9 + $0x14] sm:$0xf] }
  0xa6   : > { %2564 = vmatpush.msk.msra.mxu1 %vm245_vm1, %v2849_v58 }
  0xa7   : > { %2325 = vmatmul.msk.f32.vlgmr.msra.gmra.mxu1 %vm260_vm8, %v358_v7 }
  0xab   : > { %v2877_v9 = vpop.permute.xlu0 %462  ;;  %v692_v13 = vpop.permute.xlu2 %691 }
  0xac   : > { %v468_v56 = vsel %vm3699_vm10, %v2877_v9, %v2870_v6 }
  0xaf   : > { %2326 = vmatmul.msk.f32.gmra.mxu1 %vm260_vm8, %v359_v12 }
  0xb3   : > { %v575_v16 = vpop.permute.xlu0 %574  ;;  %v2903_v24 = vpop.permute.xlu2 %810 }
  0xb4   : > { %v578_v18 = vsel %vm3700_vm12, %v573_v4, %v575_v16 }
  0xb5   : > { %v582_v20 = vsel %vm2890_vm13, %v578_v18, 0.0 }
  0xb6   : > { %2356 = vmatpush.msk.msrb.mxu2 %vm245_vm1, %v582_v20 }
  0xb7   : > { %2327 = vmatmul.msk.f32.gmra.mxu1 %vm260_vm8, %v360_v19  ;;  %2357 = vmatmul.msk.f32.vlgmr.msrb.gmra.mxu2 %vm260_vm8, %v2347_v28 }
  0xb9   : > { %812 = vrot.lane.b32.xlu1 %v807_v30, %s2695_s15  ;;  %v678_v30 = vsel %vm677_vm3, 1, %v2698_v49 }
  0xba   : > { %v679_v33 = vperm.slane %v678_v30, 0 }
  0xbb   : > { %v571_v26 = vpop.permute.xlu0 %570  ;;  %v809_v31 = vpop.permute.xlu2 %808 }
  0xbc   : > { %v577_v27 = vsel %vm3700_vm12, %v571_v26, %v573_v4  ;;  %v815_v32 = vsel %vm814_vm5, %v809_v31, %v2903_v24  ;;  %vm2932_vm11 = vcmp.eq.s32.totalorder %v679_v33, 1  ;;  %vm1036_vm12 = vcmask 736256  }
  0xbd   : > { %v581_v29 = vsel %vm2907_vm14, %v577_v27, 0.0 }
  0xbe   : > { %2351 = vmatpush.msk.msrb.mxu1 %vm245_vm1, %v581_v29 }
  0xbf   : > { %2352 = vmatmul.msk.f32.vlgmr.msrb.gmra.mxu1 %vm260_vm8, %v2347_v28  ;;  %2358 = vmatmul.msk.f32.gmra.mxu2 %vm260_vm8, %v2348_v37  ;;  %v2376_v28 = vld [vmem:[%s3695_s2 + $0x88] sm:$0xff] }
  0xc0   : > { %2379 = vmatpush.msk.msra.mxu1 %vm245_vm1, %v815_v32 }
  0xc1   : > { %922 = vrot.lane.b32.xlu1 %v917_v36, %s2696_s16  ;;  %v1458_v36 = vld [vmem:[%s2790_s9 + $0x10] sm:$0xf]  ;;  %s2702_s16 = smov 116  }
  0xc2   : > { %1463 = vst [vmem:[#allocation1 + $0x10] ss:$2 sm:$0xff] %v1458_v36 }
  0xc3   : > { %v694_v34 = vpop.permute.xlu0 %693 }
  0xc4   : > { %v698_v40 = vsel %vm697_vm9, %v692_v13, %v694_v34 }
  0xc5   : > { %v702_v45 = vsel %vm2932_vm11, %v698_v40, 0.0  ;;  %v2335_v40 = vld [vmem:[%s3695_s2 + $0x30] sm:$0xff] }
  0xc7   : > { %2353 = vmatmul.msk.f32.gmra.mxu1 %vm260_vm8, %v2348_v37  ;;  %2359 = vmatmul.msk.f32.gmra.mxu2 %vm260_vm8, %v2349_v52 }
  0xc9   : > { %1144 = vrot.lane.b32.xlu1 %v1140_v44, %s2699_s26  ;;  %v467_v44 = vsel %vm3699_vm10, %v2865_v1, %v2877_v9  ;;  %v1466_v51 = vld.sshfl [vmem:[#allocation1 + $0x10] sm:$0xff pattern:$0x75316420]  ;;  %v2350_v1 = vld [vmem:[%s3695_s2 + $0x58] sm:$0xff] }
  0xca   : > { %1471 = vrot.lane.b32.xlu2 %v1466_v51, %s2701_s6  ;;  %1575 = vst [vmem:[#allocation1 + $0x10] ss:$2 sm:$0xff] %v1570_v53  ;;  %s2703_s6 = smov 110  }
  0xcb   : > { %1698 = vrot.lane.b32.xlu0 %v1694_v59, %s2703_s6 }
  0xcf   : > { %2354 = vmatmul.msk.f32.gmra.mxu1 %vm260_vm8, %v2349_v52  ;;  %2360 = vmatmul.msk.f32.gmra.mxu2 %vm260_vm8, %v2350_v1 }
  0xd1   : > { %1146 = vrot.lane.b32.xlu1 %v1141_v46, %s2699_s26  ;;  %v696_v46 = vpop.permute.xlu0 %695  ;;  %v1578_v3 = vld.sshfl [vmem:[#allocation1 + $0x10] sm:$0xff pattern:$0x75316420] }
  0xd2   : > { %v699_v5 = vsel %vm697_vm9, %v694_v34, %v696_v46  ;;  %1579 = vrot.lane.b32.xlu2 %v1576_v50, %s2702_s16  ;;  %vm924_vm9 = vcmask 326656   ;;  %v1788_v34 = vld [vmem:[%s2790_s9 + $0x14] sm:$0xf] }
  0xd3   : > { %1696 = vrot.lane.b32.xlu0 %v1693_v61, %s2703_s6 }
  0xd7   : > { %2355 = vmatmul.msk.f32.gmra.mxu1 %vm260_vm8, %v2350_v1  ;;  %v1900_v1 = vld [vmem:[%s2790_s9 + $0x14] sm:$0xf] }
  0xd9   : > { %1357 = vrot.lane.b32.xlu1 %v1353_v2, %s2700_s30  ;;  %v919_v62 = vpop.permute.xlu0 %918  ;;  %v901_v2 = vadd.s32 6, %v2832_v47  ;;  %v255_v47 = vld [vmem:[%s3696_s3 + $0x18] sm:$0xff] }
  0xdb   : > { %vm902_vm2 = vcmp.ge.s32.totalorder %v901_v2, 0  ;;  %vm903_vm3 = vcmp.lt.s32.totalorder %v901_v2, 16  ;;  %v2404_v2 = vld [vmem:[%s3695_s2 + $0xc8] sm:$0xff] }
  0xdc   : > { %vm904_vm10 = vmand %vm902_vm2, %vm903_vm3  ;;  %vm1585_vm3 = vcmask 949248  }
  0xdd   : > { %v905_v6 = vsel %vm904_vm10, 1, %v2698_v49  ;;  %vm1473_vm10 = vcmask 539648  }
  0xde   : > { %v906_v8 = vperm.slane %v905_v6, 0  ;;  %v907_v19 = vperm.slane %v905_v6, 1  ;;  %v2405_v6 = vld [vmem:[%s3695_s2 + $0xd0] sm:$0xff] }
  0xdf   : > { %2380 = vmatmul.msk.f32.vlgmr.msra.gmra.mxu1 %vm260_vm8, %v2375_v11 }
  0xe0   : > { %vm3005_vm2 = vcmp.eq.s32.totalorder %v906_v8, 1 }
  0xe1   : > { %1359 = vrot.lane.b32.xlu1 %v1354_v21, %s2700_s30  ;;  %v1033_v9 = vpop.permute.xlu0 %1032  ;;  %v1795_v21 = vld.sshfl [vmem:[#allocation1 + $0x8] sm:$0xff pattern:$0x75316420] }
  0xe2   : > { %1903 = vst [vmem:[#allocation1] ss:$2 sm:$0xff] %v2925_v35 }
  0xe7   : > { %2381 = vmatmul.msk.f32.gmra.mxu1 %vm260_vm8, %v2376_v28 }
  0xe9   : > { %1581 = vrot.lane.b32.xlu1 %v1577_v48, %s2702_s16  ;;  %v1031_v20 = vpop.permute.xlu0 %1030  ;;  %v1907_v33 = vld.sshfl [vmem:[#allocation1 + $0x8] sm:$0xff pattern:$0x75316420]  ;;  %v1906_v37 = vld.sshfl [vmem:[#allocation1] sm:$0xff pattern:$0x75316420] }
  0xea   : > { %v1037_v23 = vsel %vm1036_vm12, %v1031_v20, %v1033_v9  ;;  %1911 = vrot.lane.b32.xlu0 %v1907_v33, %s2691_s11  ;;  %2019 = vst [vmem:[#allocation1] ss:$2 sm:$0xff] %v2925_v35 }
  0xeb   : > { %v1041_v26 = vsel %vm2843_vm6, %v1037_v23, 0.0 }
  0xec   : > { %2407 = vmatpush.msk.msrb.mxu1 %vm245_vm1, %v1041_v26  ;;  %v2390_v26 = vld [vmem:[%s3695_s2 + $0xa8] sm:$0xff] }
  0xf1   : > { %1583 = vrot.lane.b32.xlu1 %v1578_v3, %s2702_s16  ;;  %v2023_v61 = vld.sshfl [vmem:[#allocation1 + $0x8] sm:$0xff pattern:$0x75316420] }
  0xf2   : > { %1909 = vrot.lane.b32.xlu0 %v1906_v37, %s2691_s11  ;;  %v2362_v3 = vld [vmem:[%s3695_s2 + $0x68] sm:$0xff]  ;;  %v2391_v37 = vld [vmem:[%s3695_s2 + $0xb0] sm:$0xff] }
  0xf9   : > { %1799 = vrot.lane.b32.xlu1 %v1795_v21, %s2704_s23 }
 0x113   : > { %v250_v38 = vpop.xlane.xlu1 %249 }
 0x114   : > { %v251_v41 = vmul.f32 0.00390625, %v250_v38  ;;  %v2377_v38 = vld [vmem:[%s3695_s2 + $0x90] sm:$0xff] }
 0x115   : > { %2382 = vmatmul.msk.f32.gmra.mxu1 %vm260_vm8, %v2377_v38 }
 0x116   : > { %2318 = vmatpush.msk.msra.mxu0 %vm245_vm1, %v251_v41  ;;  %2563 = vmatpush.msk.msra.mxu3 %vm245_vm1, %v251_v41 }
 0x117   : > { %2319 = vmatmul.msk.f32.vlgmr.msra.gmra.mxu0 %vm260_vm8, %v252_v42  ;;  %2320 = vmatmul.msk.f32.vlgmr.msra.gmra.mxu3 %vm260_vm8, %v253_v43  ;;  %v1258_v43 = vpop.permute.xlu0 %1257 }
 0x118   : > { %2323 = vmatpush.msk.msrb.mxu0 %vm245_vm1, %v2849_v58  ;;  %2337 = vmatpush.msk.msrb.mxu3 %vm245_vm1, %v467_v44  ;;  %v680_v58 = vperm.slane %v678_v30, 1  ;;  %v2334_v30 = vld [vmem:[%s3695_s2 + $0x28] sm:$0xff]  ;;  %v2378_v44 = vld [vmem:[%s3695_s2 + $0x98] sm:$0xff] }
 0x11a   : > { %2328 = vmatpush.msk.msra.mxu0 %vm245_vm1, %v2861_v63  ;;  %2365 = vmatpush.msk.msra.mxu3 %vm245_vm1, %v702_v45  ;;  %v2979_v63 = vpop.permute.xlu2 %920  ;;  %vm2988_vm15 = vcmp.eq.s32.totalorder %v680_v58, 1  ;;  %v2336_v45 = vld [vmem:[%s3695_s2 + $0x38] sm:$0xff] }
 0x11b   : > { %v703_v7 = vsel %vm2988_vm15, %v699_v5, 0.0  ;;  %v925_v49 = vsel %vm924_vm9, %v919_v62, %v2979_v63  ;;  %v2022_v62 = vld.sshfl [vmem:[#allocation1] sm:$0xff pattern:$0x75316420]  ;;  %v2011_v5 = vld [vmem:[%s2790_s9 + $0x14] sm:$0xf] }
 0x11c   : > { %v929_v16 = vsel %vm3005_vm2, %v925_v49, 0.0  ;;  %2119 = vst [vmem:[#allocation1] ss:$2 sm:$0xff] %v2925_v35 }
 0x11d   : > { %2383 = vmatmul.msk.f32.gmra.mxu1 %vm260_vm8, %v2378_v44 }
 0x11f   : > { %2321 = vmatmul.msk.f32.gmra.mxu3 %vm260_vm8, %v254_v54  ;;  %2324 = vmatmul.msk.f32.vlgmr.msrb.gmra.mxu0 %vm260_vm8, %v357_v55  ;;  %v1256_v50 = vpop.permute.xlu0 %1255  ;;  %v2403_v54 = vld [vmem:[%s3695_s2 + $0xc0] sm:$0xff] }
 0x120   : > { %2342 = vmatpush.msk.msrb.mxu0 %vm245_vm1, %v468_v56  ;;  %v1261_v51 = vsel %vm240_vm0, %v1256_v50, %v1258_v43 }
 0x121   : > { %2435 = vmatpush.msk.msra.mxu1 %vm245_vm1, %v1261_v51 }
 0x122   : > { %v1035_v0 = vpop.permute.xlu2 %1034 }
 0x123   : > { %v1038_v12 = vsel %vm1036_vm12, %v1033_v9, %v1035_v0  ;;  %vm1148_vm12 = vcmask 687104   ;;  %v2123_v35 = vld.sshfl [vmem:[#allocation1 + $0x8] sm:$0xff pattern:$0x75316420]  ;;  %v2406_v0 = vld [vmem:[%s3695_s2 + $0xd8] sm:$0xff] }
 0x124   : > { %v1042_v18 = vsel %vm2854_vm7, %v1038_v12, 0.0  ;;  %2127 = vrot.lane.b32.xlu0 %v2123_v35, %s2693_s13  ;;  %v2122_v8 = vld.sshfl [vmem:[#allocation1] sm:$0xff pattern:$0x75316420]  ;;  %v2116_v12 = vld [vmem:[%s2790_s9 + $0x14] sm:$0xf] }
 0x125   : > { %2408 = vmatmul.msk.f32.vlgmr.msrb.gmra.mxu1 %vm260_vm8, %v2403_v54 }
 0x127   : > { %2322 = vmatmul.msk.f32.gmra.mxu3 %vm260_vm8, %v255_v47  ;;  %2329 = vmatmul.msk.f32.vlgmr.msra.gmra.mxu0 %vm260_vm8, %v357_v55  ;;  %v2361_v55 = vld [vmem:[%s3695_s2 + $0x60] sm:$0xff]  ;;  %v1470_v49 = vpop.permute.xlu0 %1469 }
 0x128   : > { %2370 = vmatpush.msk.msra.mxu0 %vm245_vm1, %v703_v7  ;;  %v2363_v7 = vld [vmem:[%s3695_s2 + $0x70] sm:$0xff] }
 0x12a   : > { %v1143_v46 = vpop.permute.xlu2 %1142 }
 0x12b   : > { %v813_v13 = vpop.permute.xlu1 %812 }
 0x12c   : > { %v816_v14 = vsel %vm814_vm5, %v2903_v24, %v813_v13  ;;  %v1682_v24 = vld [vmem:[%s2790_s9 + $0x14] sm:$0xf]  ;;  %vm3037_vm5 = vcmp.eq.s32.totalorder %v907_v19, 1  ;;  %2125 = vrot.lane.b32.xlu0 %v2122_v8, %s2693_s13 }
 0x12d   : > { %2384 = vmatpush.msk.msra.mxu2 %vm245_vm1, %v816_v14  ;;  %1692 = vst [vmem:[#allocation1 + $0x10] ss:$2 sm:$0xff] %v1682_v24  ;;  %2409 = vmatmul.msk.f32.gmra.mxu1 %vm260_vm8, %v2404_v2  ;;  %v2432_v24 = vld [vmem:[%s3695_s2 + $0x108] sm:$0xff] }
 0x12e   : > { %2385 = vmatmul.msk.f32.vlgmr.msra.gmra.mxu2 %vm260_vm8, %v2375_v11  ;;  %v2364_v11 = vld [vmem:[%s3695_s2 + $0x78] sm:$0xff] }
 0x12f   : > { %2338 = vmatmul.msk.f32.vlgmr.msrb.gmra.mxu3 %vm260_vm8, %v2333_v15  ;;  %2343 = vmatmul.msk.f32.vlgmr.msrb.gmra.mxu0 %vm260_vm8, %v2333_v15  ;;  %v1468_v19 = vpop.permute.xlu0 %1467 }
 0x130   : > { %2393 = vmatpush.msk.msrb.mxu3 %vm245_vm1, %v929_v16  ;;  %2412 = vmatpush.msk.msrb.mxu2 %vm245_vm1, %v1042_v18  ;;  %v2431_v16 = vld [vmem:[%s3695_s2 + $0x100] sm:$0xff]  ;;  %v1474_v21 = vsel %vm1473_vm10, %v1468_v19, %v1470_v49  ;;  %v2420_v19 = vld [vmem:[%s3695_s2 + $0xf8] sm:$0xff] }
 0x131   : > { %v2389_v18 = vld [vmem:[%s3695_s2 + $0xa0] sm:$0xff] }
 0x132   : > { %v1260_v59 = vpop.permute.xlu2 %1259 }
 0x133   : > { %v923_v29 = vpop.permute.xlu1 %922 }
 0x134   : > { %v926_v31 = vsel %vm924_vm9, %v2979_v63, %v923_v29  ;;  %v1695_v36 = vld.sshfl [vmem:[#allocation1 + $0x10] sm:$0xff pattern:$0x75316420]  ;;  %v1262_v63 = vsel %vm240_vm0, %v1258_v43, %v1260_v59  ;;  %vm1361_vm0 = vcmask 588800   ;;  %vm1702_vm9 = vcmask 900096  }
 0x135   : > { %v930_v32 = vsel %vm3037_vm5, %v926_v31, 0.0  ;;  %1700 = vrot.lane.b32.xlu2 %v1695_v36, %s2703_s6  ;;  %1793 = vst [vmem:[#allocation1 + $0x10] ss:$2 sm:$0xff] %v1788_v34  ;;  %2440 = vmatpush.msk.msra.mxu2 %vm245_vm1, %v1262_v63  ;;  %v3177_v34 = vpop.f32.mrf.mxu2  ;;  %v2433_v36 = vld [vmem:[%s3695_s2 + $0x110] sm:$0xff] }
 0x136   : > { %2398 = vmatpush.msk.msrb.mxu0 %vm245_vm1, %v930_v32  ;;  %2386 = vmatmul.msk.f32.gmra.mxu2 %vm260_vm8, %v2376_v28 }
 0x137   : > { %2339 = vmatmul.msk.f32.gmra.mxu3 %vm260_vm8, %v2334_v30  ;;  %2344 = vmatmul.msk.f32.gmra.mxu0 %vm260_vm8, %v2334_v30 }
 0x138   : > { %2410 = vmatmul.msk.f32.gmra.mxu1 %vm260_vm8, %v2405_v6 }
 0x13a   : > { %v1356_v14 = vpop.permute.xlu2 %1355 }
 0x13b   : > { %v1145_v41 = vpop.permute.xlu1 %1144 }
 0x13c   : > { %v1796_v42 = vld.sshfl [vmem:[#allocation1 + $0x10] sm:$0xff pattern:$0x75316420]  ;;  %v1149_v52 = vsel %vm1148_vm12, %v1143_v46, %v1145_v41  ;;  %v2459_v46 = vld [vmem:[%s3695_s2 + $0x140] sm:$0xff] }
 0x13d   : > { %1801 = vrot.lane.b32.xlu1 %v1796_v42, %s2704_s23  ;;  %1797 = vrot.lane.b32.xlu2 %v1794_v22, %s2704_s23  ;;  %v1153_v56 = vsel %vm2932_vm11, %v1149_v52, 0.0  ;;  %1905 = vst [vmem:[#allocation1 + $0x10] ss:$2 sm:$0xff] %v1900_v1  ;;  %v1478_v22 = vsel %vm2907_vm14, %v1474_v21, 0.0  ;;  %v2392_v42 = vld [vmem:[%s3695_s2 + $0xb8] sm:$0xff]  ;;  %s2646_s23 = scalar_lea.hbm %s3698_s5, 128 }
 0x13e   : > { %2387 = vmatmul.msk.f32.gmra.mxu2 %vm260_vm8, %v2377_v38  ;;  %2463 = vmatpush.msk.msrb.mxu1 %vm245_vm1, %v1478_v22  ;;  %v3189_v38 = vpop.f32.mrf.mxu1  ;;  %v259_v22 = vld [vmem:[%s3697_s4 + $0x18] sm:$0xff] }
 0x13f   : > { %2340 = vmatmul.msk.f32.gmra.mxu3 %vm260_vm8, %v2335_v40  ;;  %2345 = vmatmul.msk.f32.gmra.mxu0 %vm260_vm8, %v2335_v40  ;;  %v3193_v40 = vpop.f32.mrf.mxu2 }
 0x140   : > { %2411 = vmatmul.msk.f32.gmra.mxu1 %vm260_vm8, %v2406_v0 }
 0x142   : > { %v1472_v29 = vpop.permute.xlu2 %1471 }
 0x143   : > { %v1147_v48 = vpop.permute.xlu1 %1146  ;;  %v1475_v31 = vsel %vm1473_vm10, %v1470_v49, %v1472_v29  ;;  %v2419_v49 = vld [vmem:[%s3695_s2 + $0xf0] sm:$0xff] }
 0x144   : > { %v1150_v53 = vsel %vm1148_vm12, %v1145_v41, %v1147_v48  ;;  %v1908_v47 = vld.sshfl [vmem:[#allocation1 + $0x10] sm:$0xff pattern:$0x75316420]  ;;  %v1479_v33 = vsel %vm2890_vm13, %v1475_v31, 0.0  ;;  %v2434_v41 = vld [vmem:[%s3695_s2 + $0x118] sm:$0xff]  ;;  %v2417_v48 = vld [vmem:[%s3695_s2 + $0xe0] sm:$0xff] }
 0x145   : > { %v1154_v58 = vsel %vm2988_vm15, %v1150_v53, 0.0  ;;  %2027 = vrot.lane.b32.xlu1 %v2023_v61, %s2692_s12  ;;  %1913 = vrot.lane.b32.xlu2 %v1908_v47, %s2691_s11  ;;  %2021 = vst [vmem:[#allocation1 + $0x10] ss:$2 sm:$0xff] %v2011_v5  ;;  %v2418_v61 = vld [vmem:[%s3695_s2 + $0xe8] sm:$0xff]  ;;  %v2487_v31 = vld [vmem:[%s3695_s2 + $0x180] sm:$0xff] }
 0x146   : > { %2388 = vmatmul.msk.f32.gmra.mxu2 %vm260_vm8, %v2378_v44  ;;  %v3203_v43 = vpop.f32.mrf.mxu1  ;;  %v257_v47 = vld [vmem:[%s3697_s4 + $0x8] sm:$0xff] }
 0x147   : > { %2341 = vmatmul.msk.f32.gmra.mxu3 %vm260_vm8, %v2336_v45  ;;  %2346 = vmatmul.msk.f32.gmra.mxu0 %vm260_vm8, %v2336_v45  ;;  %v3207_v44 = vpop.f32.mrf.mxu2 }
 0x148   : > { %2436 = vmatmul.msk.f32.vlgmr.msra.gmra.mxu1 %vm260_vm8, %v2431_v16 }
 0x14a   : > { %v1580_v45 = vpop.permute.xlu2 %1579 }
 0x14b   : > { %v1358_v13 = vpop.permute.xlu1 %1357 }
 0x14c   : > { %v2024_v9 = vld.sshfl [vmem:[#allocation1 + $0x10] sm:$0xff pattern:$0x75316420]  ;;  %v1362_v15 = vsel %vm1361_vm0, %v1356_v14, %v1358_v13 }
 0x14d   : > { %2029 = vrot.lane.b32.xlu1 %v2024_v9, %s2692_s12  ;;  %2025 = vrot.lane.b32.xlu2 %v2022_v62, %s2692_s12  ;;  %2121 = vst [vmem:[#allocation1 + $0x10] ss:$2 sm:$0xff] %v2116_v12  ;;  %v1366_v20 = vsel %vm3005_vm2, %v1362_v15, 0.0  ;;  %v2461_v9 = vld [vmem:[%s3695_s2 + $0x150] sm:$0xff]  ;;  %s215_s12 = sand.u32 1, %s2680_s19  }
 0x14e   : > { %2413 = vmatmul.msk.f32.vlgmr.msrb.gmra.mxu2 %vm260_vm8, %v2403_v54  ;;  %v3217_v51 = vpop.f32.mrf.mxu1  ;;  %s2316_s7 = sshll.u32 %s215_s12, 6  ;;  %s2235_s22 = scalar_lea.sflag [#allocation3], %s215_s12 }
 0x14f   : > { %2366 = vmatmul.msk.f32.vlgmr.msra.gmra.mxu3 %vm260_vm8, %v2361_v55  ;;  %2371 = vmatmul.msk.f32.vlgmr.msra.gmra.mxu0 %vm260_vm8, %v2361_v55  ;;  %v3224_v54 = vpop.f32.mrf.mxu2  ;;  %v256_v55 = vld [vmem:[%s3697_s4] sm:$0xff]  ;;  %s3639_s8 = scalar_lea.vmem [#allocation2], %s2316_s7 }
 0x150   : > { %2421 = vmatpush.msk.msra.mxu3 %vm245_vm1, %v1153_v56  ;;  %2426 = vmatpush.msk.msra.mxu0 %vm245_vm1, %v1154_v58  ;;  %v1699_v56 = vpop.permute.xlu0 %1698  ;;  %s2247_s6 = sshll.u32 %s3639_s8, 4  ;;  %s2248_s6 = int_to_ptr.vmem [resolvable:$true] %s2247_s6 }
 0x151   : > { %2437 = vmatmul.msk.f32.gmra.mxu1 %vm260_vm8, %v2432_v24  ;;  %2468 = vmatpush.msk.msrb.mxu2 %vm245_vm1, %v1479_v33  ;;  %v2445_v33 = vld [vmem:[%s3695_s2 + $0x120] sm:$0xff] }
 0x153   : > { %v1360_v28 = vpop.permute.xlu1 %1359 }
 0x154   : > { %v2124_v23 = vld.sshfl [vmem:[#allocation1 + $0x10] sm:$0xff pattern:$0x75316420]  ;;  %v1363_v30 = vsel %vm1361_vm0, %v1358_v13, %v1360_v28 }
 0x155   : > { %2129 = vrot.lane.b32.xlu2 %v2124_v23, %s2693_s13  ;;  %v1367_v32 = vsel %vm3037_vm5, %v1363_v30, 0.0  ;;  %v258_v13 = vld [vmem:[%s3697_s4 + $0x10] sm:$0xff]  ;;  %s2249_s13 = sshll.u32 %s2246_s10, 4  ;;  %s2250_s13 = int_to_ptr.hbm [resolvable:$true] %s2249_s13 }
 0x156   : > { %2414 = vmatmul.msk.f32.gmra.mxu2 %vm260_vm8, %v2404_v2  ;;  %s2640_s16 = sshra.s32 %s2250_s13, 4  ;;  %s2641_s16 = int_to_ptr.hbm [resolvable:$true] %s2640_s16 }
 0x157   : > { %2367 = vmatmul.msk.f32.gmra.mxu3 %vm260_vm8, %v2362_v3  ;;  %2372 = vmatmul.msk.f32.gmra.mxu0 %vm260_vm8, %v2362_v3  ;;  %v3242_v3 = vpop.f32.mrf.mxu1  ;;  %v3247_v5 = vpop.f32.mrf.mxu2  ;;  %s2642_s17 = scalar_lea.hbm %s2641_s16, 64  ;;  %p2647_p0 = scmp.lt.s32.totalorder %s2641_s16, %s3698_s5 }
 0x158   : > { %p2643_p11 = scmp.ne.s32.totalorder %s2641_s16, %s2642_s17  ;;  %p2648_p1 = scmp.lt.s32.totalorder %s2646_s23, %s2642_s17 }
 0x159   : > { %2438 = vmatmul.msk.f32.gmra.mxu1 %vm260_vm8, %v2433_v36 }
 0x15a   : > { %p2644_p12 = pnand %p2643_p11, %p2775_p5  ;;  %p2649_p2 = por %p2648_p1, %p2647_p0 }
 0x15b   : > { %v1582_v50 = vpop.permute.xlu1 %1581 }
 0x15c   : > { %v1586_v52 = vsel %vm1585_vm3, %v1580_v45, %v1582_v50  ;;  %p2645_p13 = pneg %p2644_p12 }
 0x15d   : > { %v1590_v53 = vsel %vm2932_vm11, %v1586_v52, 0.0  ;;  %vm1803_vm11 = vcmask 850944   ;;  %v2446_v52 = vld [vmem:[%s3695_s2 + $0x128] sm:$0xff] }
 0x15e   : > { %2415 = vmatmul.msk.f32.gmra.mxu2 %vm260_vm8, %v2405_v6  ;;  %p2650_p3 = pnand %p2649_p2, %p2645_p13 }
 0x15f   : > { %2368 = vmatmul.msk.f32.gmra.mxu3 %vm260_vm8, %v2363_v7  ;;  %2373 = vmatmul.msk.f32.gmra.mxu0 %vm260_vm8, %v2363_v7  ;;  %v1697_v7 = vpop.permute.xlu0 %1696  ;;  %v3269_v12 = vpop.f32.mrf.mxu2 }
 0x160   : > { %v1703_v4 = vsel %vm1702_vm9, %v1697_v7, %v1699_v56  ;;  %v2448_v7 = vld [vmem:[%s3695_s2 + $0x138] sm:$0xff] }
 0x161   : > { %2439 = vmatmul.msk.f32.gmra.mxu1 %vm260_vm8, %v2434_v41 }
 0x162   : > { %2491 = vmatpush.msk.msra.mxu1 %vm245_vm1, %v1703_v4 }
 0x163   : > { %v1584_v62 = vpop.permute.xlu1 %1583 }
 0x164   : > { %v1587_v2 = vsel %vm1585_vm3, %v1582_v50, %v1584_v62  ;;  %v2447_v62 = vld [vmem:[%s3695_s2 + $0x130] sm:$0xff] }
 0x165   : > { %v1591_v35 = vsel %vm2988_vm15, %v1587_v2, 0.0 }
 0x166   : > { %2416 = vmatmul.msk.f32.gmra.mxu2 %vm260_vm8, %v2406_v0 }
 0x167   : > { %2369 = vmatmul.msk.f32.gmra.mxu3 %vm260_vm8, %v2364_v11  ;;  %2374 = vmatmul.msk.f32.gmra.mxu0 %vm260_vm8, %v2364_v11  ;;  %v3265_v11 = vpop.f32.mrf.mxu1  ;;  %v3290_v21 = vpop.f32.mrf.mxu2 }
 0x168   : > { %v1912_v29 = vpop.permute.xlu0 %1911 }
 0x169   : > { %2464 = vmatmul.msk.f32.vlgmr.msrb.gmra.mxu1 %vm260_vm8, %v2459_v46 }
 0x16b   : > { %v1800_v23 = vpop.permute.xlu1 %1799 }
 0x16e   : > { %2441 = vmatmul.msk.f32.vlgmr.msra.gmra.mxu2 %vm260_vm8, %v2431_v16  ;;  %v2462_v16 = vld [vmem:[%s3695_s2 + $0x158] sm:$0xff] }
 0x16f   : > { %2394 = vmatmul.msk.f32.vlgmr.msrb.gmra.mxu3 %vm260_vm8, %v2389_v18  ;;  %2399 = vmatmul.msk.f32.vlgmr.msrb.gmra.mxu0 %vm260_vm8, %v2389_v18 }
 0x170   : > { %2449 = vmatpush.msk.msrb.mxu3 %vm245_vm1, %v1366_v20  ;;  %2454 = vmatpush.msk.msrb.mxu0 %vm245_vm1, %v1367_v32  ;;  %v3284_v20 = vpop.f32.mrf.mxu1  ;;  %v1910_v45 = vpop.permute.xlu0 %1909 }
 0x171   : > { %2465 = vmatmul.msk.f32.gmra.mxu1 %vm260_vm8, %v2460_v39 }
 0x176   : > { %2442 = vmatmul.msk.f32.gmra.mxu2 %vm260_vm8, %v2432_v24 }
 0x177   : > { %2395 = vmatmul.msk.f32.gmra.mxu3 %vm260_vm8, %v2390_v26  ;;  %2400 = vmatmul.msk.f32.gmra.mxu0 %vm260_vm8, %v2390_v26 }
 0x179   : > { %2466 = vmatmul.msk.f32.gmra.mxu1 %vm260_vm8, %v2461_v9 }
 0x17e   : > { %2443 = vmatmul.msk.f32.gmra.mxu2 %vm260_vm8, %v2433_v36 }
 0x17f   : > { %2396 = vmatmul.msk.f32.gmra.mxu3 %vm260_vm8, %v2391_v37  ;;  %2401 = vmatmul.msk.f32.gmra.mxu0 %vm260_vm8, %v2391_v37  ;;  %v3306_v37 = vpop.f32.mrf.mxu1 }
 0x181   : > { %2467 = vmatmul.msk.f32.gmra.mxu1 %vm260_vm8, %v2462_v16 }
 0x186   : > { %2444 = vmatmul.msk.f32.gmra.mxu2 %vm260_vm8, %v2434_v41 }
 0x187   : > { %2397 = vmatmul.msk.f32.gmra.mxu3 %vm260_vm8, %v2392_v42  ;;  %2402 = vmatmul.msk.f32.gmra.mxu0 %vm260_vm8, %v2392_v42 }
 0x189   : > { %2492 = vmatmul.msk.f32.vlgmr.msra.gmra.mxu1 %vm260_vm8, %v2487_v31 }
 0x18e   : > { %2469 = vmatmul.msk.f32.vlgmr.msrb.gmra.mxu2 %vm260_vm8, %v2459_v46 }
 0x18f   : > { %2422 = vmatmul.msk.f32.vlgmr.msra.gmra.mxu3 %vm260_vm8, %v2417_v48  ;;  %2427 = vmatmul.msk.f32.vlgmr.msra.gmra.mxu0 %vm260_vm8, %v2417_v48  ;;  %v1701_v58 = vpop.permute.xlu2 %1700  ;;  %v1915_v48 = vsel %vm350_vm4, %v1910_v45, %v1912_v29  ;;  %v2474_v45 = vld [vmem:[%s3695_s2 + $0x168] sm:$0xff] }
 0x190   : > { %2477 = vmatpush.msk.msra.mxu3 %vm245_vm1, %v1590_v53  ;;  %v1704_v63 = vsel %vm1702_vm9, %v1699_v56, %v1701_v58  ;;  %2482 = vmatpush.msk.msra.mxu0 %vm245_vm1, %v1591_v35  ;;  %v1919_v56 = vsel %vm2843_vm6, %v1915_v48, 0.0  ;;  %vm3720_vm6 = vcmask 113664   ;;  %v2516_v48 = vld [vmem:[%s3695_s2 + $0x1c8] sm:$0xff] }
 0x191   : > { %2496 = vmatpush.msk.msra.mxu2 %vm245_vm1, %v1704_v63  ;;  %2519 = vmatpush.msk.msrb.mxu1 %vm245_vm1, %v1919_v56  ;;  %v2489_v63 = vld [vmem:[%s3695_s2 + $0x190] sm:$0xff] }
 0x192   : > { %v2475_v56 = vld [vmem:[%s3695_s2 + $0x170] sm:$0xff] }
 0x194   : > { %v293_v59 = vpop.f32.mrf.mxu0 }
 0x195   : > { %v294_v1 = vadd.f32 %v293_v59, %v256_v55  ;;  %v2488_v59 = vld [vmem:[%s3695_s2 + $0x188] sm:$0xff] }
 0x196   : > { %2470 = vmatmul.msk.f32.gmra.mxu2 %vm260_vm8, %v2460_v39  ;;  %2493 = vmatmul.msk.f32.gmra.mxu1 %vm260_vm8, %v2488_v59 }
 0x197   : > { %2423 = vmatmul.msk.f32.gmra.mxu3 %vm260_vm8, %v2418_v61  ;;  %2428 = vmatmul.msk.f32.gmra.mxu0 %vm260_vm8, %v2418_v61  ;;  %v1798_v24 = vpop.permute.xlu2 %1797  ;;  %v3335_v61 = vpop.f32.mrf.mxu1 }
 0x198   : > { %307 = vperm.xlu2 %2623, %v294_v1   ;;  %v1804_v28 = vsel %vm1803_vm11, %v1798_v24, %v1800_v23 }
 0x199   : > { %v1808_v36 = vsel %vm3005_vm2, %v1804_v28, 0.0 }
 0x19a   : > { %v296_v6 = vpop.f32.mrf.mxu3 }
 0x19b   : > { %v297_v8 = vadd.f32 %v296_v6, %v257_v47 }
 0x19c   : > { %v3259_v0 = vpop.f32.mrf.mxu0 }
 0x19d   : > { %312 = vperm.xlu1 %2624, %v297_v8   ;;  %v2490_v8 = vld [vmem:[%s3695_s2 + $0x198] sm:$0xff] }
 0x19e   : > { %2471 = vmatmul.msk.f32.gmra.mxu2 %vm260_vm8, %v2461_v9  ;;  %2494 = vmatmul.msk.f32.gmra.mxu1 %vm260_vm8, %v2489_v63 }
 0x19f   : > { %2424 = vmatmul.msk.f32.gmra.mxu3 %vm260_vm8, %v2419_v49  ;;  %2429 = vmatmul.msk.f32.gmra.mxu0 %vm260_vm8, %v2419_v49  ;;  %v1914_v10 = vpop.permute.xlu2 %1913  ;;  %v3355_v1 = vpop.f32.mrf.mxu1 }
 0x1a0   : > { %v1916_v55 = vsel %vm350_vm4, %v1912_v29, %v1914_v10  ;;  %vm3719_vm4 = vcmask 15360  }
 0x1a1   : > { %v1920_v39 = vsel %vm2854_vm7, %v1916_v55, 0.0  ;;  %vm3721_vm7 = vmmov %vm3719_vm4 }
 0x1a2   : > { %v299_v14 = vpop.f32.mrf.mxu3  ;;  %2524 = vmatpush.msk.msrb.mxu2 %vm245_vm1, %v1920_v39 }
 0x1a3   : > { %v300_v15 = vadd.f32 %v299_v14, %v258_v13  ;;  %v2128_v14 = vpop.permute.xlu0 %2127 }
 0x1a4   : > { %v3279_v18 = vpop.f32.mrf.mxu0 }
 0x1a5   : > { %317 = vperm.xlu0 %2625, %v300_v15  }
 0x1a6   : > { %2472 = vmatmul.msk.f32.gmra.mxu2 %vm260_vm8, %v2462_v16  ;;  %2495 = vmatmul.msk.f32.gmra.mxu1 %vm260_vm8, %v2490_v8 }
 0x1a7   : > { %2425 = vmatmul.msk.f32.gmra.mxu3 %vm260_vm8, %v2420_v19  ;;  %2430 = vmatmul.msk.f32.gmra.mxu0 %vm260_vm8, %v2420_v19  ;;  %v2026_v35 = vpop.permute.xlu2 %2025  ;;  %v3373_v4 = vpop.f32.mrf.mxu1  ;;  %v2473_v19 = vld [vmem:[%s3695_s2 + $0x160] sm:$0xff] }
 0x1aa   : > { %v302_v26 = vpop.f32.mrf.mxu3 }
 0x1ab   : > { %v303_v30 = vadd.f32 %v302_v26, %v259_v22  ;;  %v2515_v26 = vld [vmem:[%s3695_s2 + $0x1c0] sm:$0xff] }
 0x1ac   : > { %v3299_v32 = vpop.f32.mrf.mxu0 }
 0x1ad   : > { %322 = vperm.xlu2 %2623, %v303_v30   ;;  %v2126_v30 = vpop.permute.xlu0 %2125 }
 0x1ae   : > { %2497 = vmatmul.msk.f32.vlgmr.msra.gmra.mxu2 %vm260_vm8, %v2487_v31  ;;  %2520 = vmatmul.msk.f32.vlgmr.msrb.gmra.mxu1 %vm260_vm8, %v2515_v26 }
 0x1af   : > { %2450 = vmatmul.msk.f32.vlgmr.msrb.gmra.mxu3 %vm260_vm8, %v2445_v33  ;;  %2455 = vmatmul.msk.f32.vlgmr.msrb.gmra.mxu0 %vm260_vm8, %v2445_v33  ;;  %v1802_v46 = vpop.permute.xlu1 %1801  ;;  %v2130_v15 = vpop.permute.xlu2 %2129  ;;  %v2131_v33 = vsel %vm3721_vm7, %v2126_v30, %v2128_v14 }
 0x1b0   : > { %2505 = vmatpush.msk.msrb.mxu3 %vm245_vm1, %v1808_v36  ;;  %v1805_v53 = vsel %vm1803_vm11, %v1800_v23, %v1802_v46  ;;  %v2132_v22 = vsel %vm3719_vm4, %v2128_v14, %v2130_v15  ;;  %v3395_v28 = vpop.f32.mrf.mxu1  ;;  %v2135_v10 = vsel %vm2907_vm14, %v2131_v33, 0.0 }
 0x1b1   : > { %v3313_v41 = vpop.f32.mrf.mxu2  ;;  %v1809_v58 = vsel %vm3037_vm5, %v1805_v53, 0.0  ;;  %v2136_v24 = vsel %vm2890_vm13, %v2132_v22, 0.0  ;;  %vm3722_vm13 = vmmov %vm3720_vm6  ;;  %2547 = vmatpush.msk.msra.mxu1 %vm245_vm1, %v2135_v10  ;;  %v2543_v22 = vld [vmem:[%s3695_s2 + $0x200] sm:$0xff] }
 0x1b2   : > { %v3315_v42 = vpop.f32.mrf.mxu3  ;;  %2510 = vmatpush.msk.msrb.mxu0 %vm245_vm1, %v1809_v58  ;;  %2552 = vmatpush.msk.msra.mxu2 %vm245_vm1, %v2136_v24  ;;  %v2517_v58 = vld [vmem:[%s3695_s2 + $0x1d0] sm:$0xff] }
 0x1b4   : > { %v3318_v50 = vpop.f32.mrf.mxu0 }
 0x1b6   : > { %2498 = vmatmul.msk.f32.gmra.mxu2 %vm260_vm8, %v2488_v59  ;;  %2521 = vmatmul.msk.f32.gmra.mxu1 %vm260_vm8, %v2516_v48 }
 0x1b7   : > { %2451 = vmatmul.msk.f32.gmra.mxu3 %vm260_vm8, %v2446_v52  ;;  %2456 = vmatmul.msk.f32.gmra.mxu0 %vm260_vm8, %v2446_v52  ;;  %v2028_v9 = vpop.permute.xlu1 %2027 }
 0x1b8   : > { %v2031_v23 = vsel %vm3720_vm6, %v2026_v35, %v2028_v9  ;;  %v3421_v52 = vpop.f32.mrf.mxu1  ;;  %v2476_v35 = vld [vmem:[%s3695_s2 + $0x178] sm:$0xff] }
 0x1b9   : > { %v3343_v57 = vpop.f32.mrf.mxu2 }
 0x1ba   : > { %v3345_v60 = vpop.f32.mrf.mxu3 }
 0x1bc   : > { %v3347_v27 = vpop.f32.mrf.mxu0 }
 0x1be   : > { %2499 = vmatmul.msk.f32.gmra.mxu2 %vm260_vm8, %v2489_v63  ;;  %2522 = vmatmul.msk.f32.gmra.mxu1 %vm260_vm8, %v2517_v58 }
 0x1bf   : > { %2452 = vmatmul.msk.f32.gmra.mxu3 %vm260_vm8, %v2447_v62  ;;  %2457 = vmatmul.msk.f32.gmra.mxu0 %vm260_vm8, %v2447_v62  ;;  %v2030_v31 = vpop.permute.xlu1 %2029 }
 0x1c0   : > { %v2032_v46 = vsel %vm3722_vm13, %v2028_v9, %v2030_v31  ;;  %v3439_v39 = vpop.f32.mrf.mxu1 }
 0x1c1   : > { %v3361_v2 = vpop.f32.mrf.mxu2 }
 0x1c2   : > { %v3363_v47 = vpop.f32.mrf.mxu3 }
 0x1c4   : > { %v3365_v6 = vpop.f32.mrf.mxu0 }
 0x1c6   : > { %2500 = vmatmul.msk.f32.gmra.mxu2 %vm260_vm8, %v2490_v8 }
 0x1c7   : > { %2453 = vmatmul.msk.f32.gmra.mxu3 %vm260_vm8, %v2448_v7  ;;  %2458 = vmatmul.msk.f32.gmra.mxu0 %vm260_vm8, %v2448_v7  ;;  %v2518_v7 = vld [vmem:[%s3695_s2 + $0x1d8] sm:$0xff] }
 0x1c8   : > { %v3457_v8 = vpop.f32.mrf.mxu1  ;;  %2523 = vmatmul.msk.f32.gmra.mxu1 %vm260_vm8, %v2518_v7 }
 0x1c9   : > { %v3379_v49 = vpop.f32.mrf.mxu2 }
 0x1ca   : > { %v3381_v13 = vpop.f32.mrf.mxu3 }
 0x1cc   : > { %v3383_v16 = vpop.f32.mrf.mxu0 }
 0x1ce   : > { %2525 = vmatmul.msk.f32.vlgmr.msrb.gmra.mxu2 %vm260_vm8, %v2515_v26 }
 0x1cf   : > { %2478 = vmatmul.msk.f32.vlgmr.msra.gmra.mxu3 %vm260_vm8, %v2473_v19  ;;  %2483 = vmatmul.msk.f32.vlgmr.msra.gmra.mxu0 %vm260_vm8, %v2473_v19  ;;  %v2501_v19 = vld [vmem:[%s3695_s2 + $0x1a0] sm:$0xff] }
 0x1d0   : > { %2533 = vmatpush.msk.msra.mxu3 %vm245_vm1, %v2031_v23  ;;  %2538 = vmatpush.msk.msra.mxu0 %vm245_vm1, %v2032_v46  ;;  %v3473_v23 = vpop.f32.mrf.mxu1  ;;  %v2502_v46 = vld [vmem:[%s3695_s2 + $0x1a8] sm:$0xff] }
 0x1d1   : > { %v3402_v29 = vpop.f32.mrf.mxu2  ;;  %2548 = vmatmul.msk.f32.vlgmr.msra.gmra.mxu1 %vm260_vm8, %v2543_v22 }
 0x1d2   : > { %v3405_v17 = vpop.f32.mrf.mxu3 }
 0x1d4   : > { %v3408_v36 = vpop.f32.mrf.mxu0 }
 0x1d6   : > { %2526 = vmatmul.msk.f32.gmra.mxu2 %vm260_vm8, %v2516_v48 }
 0x1d7   : > { %2479 = vmatmul.msk.f32.gmra.mxu3 %vm260_vm8, %v2474_v45  ;;  %2484 = vmatmul.msk.f32.gmra.mxu0 %vm260_vm8, %v2474_v45 }
 0x1d9   : > { %v3426_v53 = vpop.f32.mrf.mxu2 }
 0x1da   : > { %v3429_v25 = vpop.f32.mrf.mxu3 }
 0x1dc   : > { %v3431_v55 = vpop.f32.mrf.mxu0 }
 0x1de   : > { %2527 = vmatmul.msk.f32.gmra.mxu2 %vm260_vm8, %v2517_v58  ;;  %v3491_v58 = vpop.f32.mrf.mxu1 }
 0x1df   : > { %2480 = vmatmul.msk.f32.gmra.mxu3 %vm260_vm8, %v2475_v56  ;;  %2485 = vmatmul.msk.f32.gmra.mxu0 %vm260_vm8, %v2475_v56  ;;  %v2544_v56 = vld [vmem:[%s3695_s2 + $0x208] sm:$0xff] }
 0x1e0   : > { %2549 = vmatmul.msk.f32.gmra.mxu1 %vm260_vm8, %v2544_v56 }
 0x1e1   : > { %v3444_v59 = vpop.f32.mrf.mxu2 }
 0x1e2   : > { %v3447_v62 = vpop.f32.mrf.mxu3 }
 0x1e4   : > { %v3449_v63 = vpop.f32.mrf.mxu0 }
 0x1e6   : > { %2528 = vmatmul.msk.f32.gmra.mxu2 %vm260_vm8, %v2518_v7 }
 0x1e7   : > { %2481 = vmatmul.msk.f32.gmra.mxu3 %vm260_vm8, %v2476_v35  ;;  %2486 = vmatmul.msk.f32.gmra.mxu0 %vm260_vm8, %v2476_v35 }
 0x1e9   : > { %v3462_v9 = vpop.f32.mrf.mxu2 }
 0x1ea   : > { %v3465_v14 = vpop.f32.mrf.mxu3 }
 0x1ec   : > { %v1000_v15 = vpop.f32.mrf.mxu0 }
 0x1ee   : > { %2553 = vmatmul.msk.f32.vlgmr.msra.gmra.mxu2 %vm260_vm8, %v2543_v22  ;;  %v2503_v22 = vld [vmem:[%s3695_s2 + $0x1b0] sm:$0xff] }
 0x1ef   : > { %2506 = vmatmul.msk.f32.vlgmr.msrb.gmra.mxu3 %vm260_vm8, %v2501_v19  ;;  %2511 = vmatmul.msk.f32.vlgmr.msrb.gmra.mxu0 %vm260_vm8, %v2501_v19 }
 0x1f1   : > { %v1325_v24 = vpop.f32.mrf.mxu2 }
 0x1f2   : > { %v308_v26 = vpop.permute.xlu2 %307  ;;  %v971_v30 = vpop.f32.mrf.mxu3 }
 0x1f3   : > { %v437_v31 = vadd.f32 %v3259_v0, %v308_v26  ;;  %v438_v33 = vadd.f32 %v3279_v18, %v308_v26 }
 0x1f4   : > { %v3481_v45 = vpop.f32.mrf.mxu0 }
 0x1f5   : > { %v543_v10 = vadd.f32 %v3315_v42, %v437_v31  ;;  %v544_v48 = vadd.f32 %v3299_v32, %v438_v33  ;;  %v3515_v31 = vpop.f32.mrf.mxu1 }
 0x1f6   : > { %2554 = vmatmul.msk.f32.gmra.mxu2 %vm260_vm8, %v2544_v56 }
 0x1f7   : > { %v664_v0 = vadd.f32 %v3242_v3, %v543_v10  ;;  %v665_v18 = vadd.f32 %v3224_v54, %v544_v48  ;;  %2507 = vmatmul.msk.f32.gmra.mxu3 %vm260_vm8, %v2502_v46  ;;  %2512 = vmatmul.msk.f32.gmra.mxu0 %vm260_vm8, %v2502_v46  ;;  %v2504_v46 = vld [vmem:[%s3695_s2 + $0x1b8] sm:$0xff] }
 0x1f9   : > { %v786_v42 = vadd.f32 %v3383_v16, %v665_v18  ;;  %v785_v32 = vadd.f32 %v3405_v17, %v664_v0  ;;  %v3500_v35 = vpop.f32.mrf.mxu2  ;;  %v2545_v17 = vld [vmem:[%s3695_s2 + $0x210] sm:$0xff] }
 0x1fa   : > { %v3503_v7 = vpop.f32.mrf.mxu3  ;;  %2550 = vmatmul.msk.f32.gmra.mxu1 %vm260_vm8, %v2545_v17 }
 0x1fb   : > { %v891_v3 = vadd.f32 %v3335_v61, %v785_v32  ;;  %v892_v54 = vadd.f32 %v3313_v41, %v786_v42 }
 0x1fc   : > { %v3507_v19 = vpop.f32.mrf.mxu0 }
 0x1fd   : > { %v1012_v26 = vadd.f32 %v971_v30, %v891_v3  ;;  %v1013_v16 = vadd.f32 %v1000_v15, %v892_v54  ;;  %v3533_v10 = vpop.f32.mrf.mxu1 }
 0x1fe   : > { %2555 = vmatmul.msk.f32.gmra.mxu2 %vm260_vm8, %v2545_v17 }
 0x1ff   : > { %v1124_v33 = vadd.f32 %v3421_v52, %v1012_v26  ;;  %2508 = vmatmul.msk.f32.gmra.mxu3 %vm260_vm8, %v2503_v22  ;;  %2513 = vmatmul.msk.f32.gmra.mxu0 %vm260_vm8, %v2503_v22  ;;  %v1125_v41 = vadd.f32 %v3402_v29, %v1013_v16  ;;  %v2546_v52 = vld [vmem:[%s3695_s2 + $0x218] sm:$0xff] }
 0x201   : > { %v3522_v61 = vpop.f32.mrf.mxu2 }
 0x202   : > { %v3525_v15 = vpop.f32.mrf.mxu3  ;;  %2551 = vmatmul.msk.f32.gmra.mxu1 %vm260_vm8, %v2546_v52 }
 0x204   : > { %v1009_v30 = vpop.f32.mrf.mxu0 }
 0x205   : > { %v3550_v26 = vpop.f32.mrf.mxu1 }
 0x206   : > { %2556 = vmatmul.msk.f32.gmra.mxu2 %vm260_vm8, %v2546_v52 }
 0x207   : > { %2509 = vmatmul.msk.f32.gmra.mxu3 %vm260_vm8, %v2504_v46  ;;  %2514 = vmatmul.msk.f32.gmra.mxu0 %vm260_vm8, %v2504_v46  ;;  %v323_v29 = vpop.permute.xlu2 %322 }
 0x208   : > { %v443_v48 = vadd.f32 %v3217_v51, %v323_v29  ;;  %v444_v56 = vadd.f32 %v3207_v44, %v323_v29  ;;  %v2529_v44 = vld [vmem:[%s3695_s2 + $0x1e0] sm:$0xff] }
 0x209   : > { %v3540_v0 = vpop.f32.mrf.mxu2 }
 0x20a   : > { %v549_v18 = vadd.f32 %v3381_v13, %v443_v48  ;;  %v550_v42 = vadd.f32 %v3365_v6, %v444_v56  ;;  %v980_v32 = vpop.f32.mrf.mxu3 }
 0x20c   : > { %v670_v3 = vadd.f32 %v3306_v37, %v549_v18  ;;  %v671_v54 = vadd.f32 %v3290_v21, %v550_v42  ;;  %v1224_v22 = vpop.f32.mrf.mxu0 }
 0x20d   : > { %v1237_v51 = vadd.f32 %v1224_v22, %v1125_v41 }
 0x20e   : > { %v792_v16 = vadd.f32 %v3449_v63, %v671_v54  ;;  %v791_v17 = vadd.f32 %v3465_v14, %v670_v3 }
 0x20f   : > { %v3554_v13 = vadd.f32 %v1325_v24, %v1237_v51  ;;  %2539 = vmatmul.msk.f32.vlgmr.msra.gmra.mxu0 %vm260_vm8, %v2529_v44  ;;  %v313_v6 = vpop.permute.xlu1 %312  ;;  %2534 = vmatmul.msk.f32.vlgmr.msra.gmra.mxu3 %vm260_vm8, %v2529_v44 }
 0x210   : > { %v897_v21 = vadd.f32 %v3395_v28, %v791_v17  ;;  %v439_v37 = vadd.f32 %v3189_v38, %v313_v6  ;;  %v440_v46 = vadd.f32 %v3177_v34, %v313_v6  ;;  %v898_v41 = vadd.f32 %v3379_v49, %v792_v16  ;;  %v2530_v34 = vld [vmem:[%s3695_s2 + $0x1e8] sm:$0xff] }
 0x211   : > { %v3562_v52 = vpop.f32.mrf.mxu2 }
 0x212   : > { %v1018_v63 = vadd.f32 %v980_v32, %v897_v21  ;;  %v545_v14 = vadd.f32 %v3345_v60, %v439_v37  ;;  %v546_v24 = vadd.f32 %v3318_v50, %v440_v46  ;;  %v1195_v29 = vpop.f32.mrf.mxu3  ;;  %v1019_v48 = vadd.f32 %v1009_v30, %v898_v41  ;;  %v1520_v32 = vpop.f32.mrf.mxu1 }
 0x213   : > { %v1236_v56 = vadd.f32 %v1195_v29, %v1124_v33 }
 0x214   : > { %v1130_v18 = vadd.f32 %v3473_v23, %v1018_v63  ;;  %v666_v28 = vadd.f32 %v3265_v11, %v545_v14  ;;  %v667_v38 = vadd.f32 %v3247_v5, %v546_v24  ;;  %v1227_v42 = vpop.f32.mrf.mxu0  ;;  %v1131_v49 = vadd.f32 %v3462_v9, %v1019_v48 }
 0x215   : > { %v1337_v60 = vadd.f32 %v3491_v58, %v1236_v56 }
 0x216   : > { %v787_v50 = vadd.f32 %v3429_v25, %v666_v28  ;;  %v788_v33 = vadd.f32 %v3408_v36, %v667_v38 }
 0x217   : > { %2535 = vmatmul.msk.f32.gmra.mxu3 %vm260_vm8, %v2530_v34  ;;  %2540 = vmatmul.msk.f32.gmra.mxu0 %vm260_vm8, %v2530_v34  ;;  %v318_v11 = vpop.permute.xlu0 %317 }
 0x218   : > { %v894_v5 = vadd.f32 %v3343_v57, %v788_v33  ;;  %v441_v23 = vadd.f32 %v3203_v43, %v318_v11  ;;  %v442_v30 = vadd.f32 %v3193_v40, %v318_v11  ;;  %v893_v9 = vadd.f32 %v3355_v1, %v787_v50  ;;  %v2531_v1 = vld [vmem:[%s3695_s2 + $0x1f0] sm:$0xff] }
 0x219   : > { %v1552_v3 = vpop.f32.mrf.mxu2 }
 0x21a   : > { %v1015_v58 = vadd.f32 %v3481_v45, %v894_v5  ;;  %v547_v25 = vadd.f32 %v3363_v47, %v441_v23  ;;  %v548_v36 = vadd.f32 %v3347_v27, %v442_v30  ;;  %v1014_v54 = vadd.f32 %v3503_v7, %v893_v9  ;;  %v1198_v22 = vpop.f32.mrf.mxu3  ;;  %v1523_v16 = vpop.f32.mrf.mxu1 }
 0x21c   : > { %v1127_v44 = vadd.f32 %v3426_v53, %v1015_v58  ;;  %v668_v57 = vadd.f32 %v3284_v20, %v547_v25  ;;  %v669_v43 = vadd.f32 %v3269_v12, %v548_v36  ;;  %v1126_v40 = vadd.f32 %v3439_v39, %v1014_v54  ;;  %v1230_v51 = vpop.f32.mrf.mxu0 }
 0x21e   : > { %v1239_v45 = vadd.f32 %v1227_v42, %v1127_v44  ;;  %v789_v47 = vadd.f32 %v3447_v62, %v668_v57  ;;  %v790_v27 = vadd.f32 %v3431_v55, %v669_v43  ;;  %v1238_v7 = vadd.f32 %v1198_v22, %v1126_v40 }
 0x21f   : > { %2536 = vmatmul.msk.f32.gmra.mxu3 %vm260_vm8, %v2531_v1  ;;  %2541 = vmatmul.msk.f32.gmra.mxu0 %vm260_vm8, %v2531_v1 }
 0x220   : > { %v1340_v12 = vadd.f32 %v3500_v35, %v1239_v45  ;;  %v896_v20 = vadd.f32 %v3361_v2, %v790_v27  ;;  %v1339_v53 = vadd.f32 %v3515_v31, %v1238_v7  ;;  %v895_v39 = vadd.f32 %v3373_v4, %v789_v47  ;;  %v2532_v35 = vld [vmem:[%s3695_s2 + $0x1f8] sm:$0xff] }
 0x221   : > { %v1555_v55 = vpop.f32.mrf.mxu2 }
 0x222   : > { %v1017_v17 = vadd.f32 %v3507_v19, %v896_v20  ;;  %v1016_v62 = vadd.f32 %v3525_v15, %v895_v39  ;;  %v1201_v6 = vpop.f32.mrf.mxu3  ;;  %v1526_v15 = vpop.f32.mrf.mxu1 }
 0x224   : > { %v1129_v21 = vadd.f32 %v3444_v59, %v1017_v17  ;;  %v1128_v37 = vadd.f32 %v3457_v8, %v1016_v62  ;;  %v1233_v46 = vpop.f32.mrf.mxu0 }
 0x225   : > { %v1243_v2 = vadd.f32 %v1233_v46, %v1131_v49 }
 0x226   : > { %v1241_v41 = vadd.f32 %v1230_v51, %v1129_v21  ;;  %v1240_v31 = vadd.f32 %v1201_v6, %v1128_v37 }
 0x227   : > { %v1344_v4 = vadd.f32 %v3540_v0, %v1243_v2  ;;  %2537 = vmatmul.msk.f32.gmra.mxu3 %vm260_vm8, %v2532_v35  ;;  %2542 = vmatmul.msk.f32.gmra.mxu0 %vm260_vm8, %v2532_v35 }
 0x228   : > { %v1342_v19 = vadd.f32 %v3522_v61, %v1241_v41  ;;  %v1341_v59 = vadd.f32 %v3533_v10, %v1240_v31 }
 0x229   : > { %v1558_v24 = vpop.f32.mrf.mxu2 }
 0x22a   : > { %v1204_v8 = vpop.f32.mrf.mxu3  ;;  %v1529_v28 = vpop.f32.mrf.mxu1 }
 0x22b   : > { %v1242_v63 = vadd.f32 %v1204_v8, %v1130_v18 }
 0x22c   : > { %v1437_v14 = vpop.f32.mrf.mxu0 }
 0x22d   : > { %v1343_v29 = vadd.f32 %v3550_v26, %v1242_v63  ;;  %v1450_v48 = vadd.f32 %v1437_v14, %v3554_v13 }
 0x22f   : > { %v1562_v56 = vadd.f32 %v3562_v52, %v1450_v48 }
 0x231   : > { %v1767_v61 = vpop.f32.mrf.mxu2 }
 0x232   : > { %v1408_v0 = vpop.f32.mrf.mxu3  ;;  %v1738_v18 = vpop.f32.mrf.mxu1 }
 0x233   : > { %v1449_v38 = vadd.f32 %v1408_v0, %v1337_v60 }
 0x234   : > { %v1440_v42 = vpop.f32.mrf.mxu0 }
 0x235   : > { %v1452_v34 = vadd.f32 %v1440_v42, %v1340_v12  ;;  %v1561_v49 = vadd.f32 %v1520_v32, %v1449_v38 }
 0x237   : > { %v1564_v50 = vadd.f32 %v1552_v3, %v1452_v34 }
 0x239   : > { %v1770_v26 = vpop.f32.mrf.mxu2 }
 0x23a   : > { %v1411_v10 = vpop.f32.mrf.mxu3  ;;  %v1741_v60 = vpop.f32.mrf.mxu1 }
 0x23b   : > { %v1451_v33 = vadd.f32 %v1411_v10, %v1339_v53 }
 0x23c   : > { %v1443_v11 = vpop.f32.mrf.mxu0 }
 0x23d   : > { %v1454_v5 = vadd.f32 %v1443_v11, %v1342_v19  ;;  %v1563_v23 = vadd.f32 %v1523_v16, %v1451_v33 }
 0x23f   : > { %v1566_v30 = vadd.f32 %v1555_v55, %v1454_v5 }
 0x241   : > { %v1773_v54 = vpop.f32.mrf.mxu2 }
 0x242   : > { %v1414_v9 = vpop.f32.mrf.mxu3  ;;  %v3622_v57 = vpop.f32.mrf.mxu1 }
 0x243   : > { %v1453_v13 = vadd.f32 %v1414_v9, %v1341_v59 }
 0x244   : > { %v1446_v58 = vpop.f32.mrf.mxu0 }
 0x245   : > { %v1456_v52 = vadd.f32 %v1446_v58, %v1344_v4  ;;  %v3616_v25 = vadd.f32 %v1526_v15, %v1453_v13 }
 0x247   : > { %v3618_v36 = vadd.f32 %v1558_v24, %v1456_v52 }
 0x249   : > { %v3624_v51 = vpop.f32.mrf.mxu2 }
 0x24a   : > { %v1417_v32 = vpop.f32.mrf.mxu3  ;;  %v3626_v45 = vpop.f32.mrf.mxu1 }
 0x24b   : > { %v1455_v3 = vadd.f32 %v1417_v32, %v1343_v29 }
 0x24c   : > { %v1661_v22 = vpop.f32.mrf.mxu0 }
 0x24d   : > { %v3620_v44 = vadd.f32 %v1529_v28, %v1455_v3  ;;  %v1674_v2 = vadd.f32 %v1661_v22, %v1562_v56 }
 0x24f   : > { %v1780_v19 = vadd.f32 %v1767_v61, %v1674_v2 }
 0x251   : > { %v1990_v27 = vpop.f32.mrf.mxu2 }
 0x252   : > { %v1632_v43 = vpop.f32.mrf.mxu3  ;;  %v1961_v12 = vpop.f32.mrf.mxu1 }
 0x253   : > { %v1673_v15 = vadd.f32 %v1632_v43, %v1561_v49 }
 0x254   : > { %v1664_v40 = vpop.f32.mrf.mxu0 }
 0x255   : > { %v1676_v63 = vadd.f32 %v1664_v40, %v1564_v50  ;;  %v1779_v24 = vadd.f32 %v1738_v18, %v1673_v15 }
 0x257   : > { %v1782_v28 = vadd.f32 %v1770_v26, %v1676_v63 }
 0x259   : > { %v1993_v20 = vpop.f32.mrf.mxu2 }
 0x25a   : > { %v1635_v1 = vpop.f32.mrf.mxu3  ;;  %v1964_v17 = vpop.f32.mrf.mxu1 }
 0x25b   : > { %v1675_v42 = vadd.f32 %v1635_v1, %v1563_v23 }
 0x25c   : > { %v1667_v47 = vpop.f32.mrf.mxu0 }
 0x25d   : > { %v1678_v61 = vadd.f32 %v1667_v47, %v1566_v30  ;;  %v1781_v50 = vadd.f32 %v1741_v60, %v1675_v42 }
 0x25f   : > { %v1784_v26 = vadd.f32 %v1773_v54, %v1678_v61 }
 0x261   : > { %v1996_v6 = vpop.f32.mrf.mxu2 }
 0x262   : > { %v1638_v7 = vpop.f32.mrf.mxu3  ;;  %v3630_v21 = vpop.f32.mrf.mxu1 }
 0x263   : > { %v1677_v32 = vadd.f32 %v1638_v7, %v3616_v25 }
 0x264   : > { %v1670_v16 = vpop.f32.mrf.mxu0 }
 0x265   : > { %v1680_v22 = vadd.f32 %v1670_v16, %v3618_v36  ;;  %v1783_v1 = vadd.f32 %v3622_v57, %v1677_v32 }
 0x269   : > { %v3632_v35 = vpop.f32.mrf.mxu2 }
 0x26a   : > { %v3628_v53 = vpop.f32.mrf.mxu3  ;;  %v3634_v31 = vpop.f32.mrf.mxu1 }
 0x26c   : > { %v1879_v39 = vpop.f32.mrf.mxu0 }
 0x26d   : > { %v1892_v8 = vadd.f32 %v1879_v39, %v1780_v19  ;;  %v1679_v39 = vadd.f32 %v3628_v53, %v3620_v44 }
 0x26f   : > { %v2003_v29 = vadd.f32 %v1990_v27, %v1892_v8 }
 0x271   : > { %v2206_v59 = vpop.f32.mrf.mxu2 }
 0x272   : > { %v1850_v62 = vpop.f32.mrf.mxu3  ;;  %v2177_v0 = vpop.f32.mrf.mxu1 }
 0x273   : > { %v1891_v38 = vadd.f32 %v1850_v62, %v1779_v24 }
 0x274   : > { %v1882_v55 = vpop.f32.mrf.mxu0 }
 0x275   : > { %v1894_v34 = vadd.f32 %v1882_v55, %v1782_v28  ;;  %v2002_v11 = vadd.f32 %v1961_v12, %v1891_v38  ;;  %v1786_v12 = vadd.f32 %v3624_v51, %v1680_v22 }
 0x277   : > { %v2005_v18 = vadd.f32 %v1993_v20, %v1894_v34 }
 0x279   : > { %v2209_v33 = vpop.f32.mrf.mxu2 }
 0x27a   : > { %v1853_v37 = vpop.f32.mrf.mxu3  ;;  %v2180_v52 = vpop.f32.mrf.mxu1 }
 0x27b   : > { %v1893_v13 = vadd.f32 %v1853_v37, %v1781_v50 }
 0x27c   : > { %v1885_v46 = vpop.f32.mrf.mxu0 }
 0x27d   : > { %v1896_v30 = vadd.f32 %v1885_v46, %v1784_v26  ;;  %v2004_v43 = vadd.f32 %v1964_v17, %v1893_v13 }
 0x27f   : > { %v2007_v54 = vadd.f32 %v1996_v6, %v1896_v30  ;;  %v1785_v6 = vadd.f32 %v3626_v45, %v1679_v39 }
 0x281   : > { %v2212_v60 = vpop.f32.mrf.mxu2 }
 0x282   : > { %v1856_v41 = vpop.f32.mrf.mxu3  ;;  %v2183_v17 = vpop.f32.mrf.mxu1 }
 0x283   : > { %v1895_v25 = vadd.f32 %v1856_v41, %v1783_v1 }
 0x284   : > { %v1888_v4 = vpop.f32.mrf.mxu0 }
 0x285   : > { %v1898_v36 = vadd.f32 %v1888_v4, %v1786_v12  ;;  %v2006_v62 = vadd.f32 %v3630_v21, %v1895_v25 }
 0x287   : > { %v2009_v51 = vadd.f32 %v3632_v35, %v1898_v36 }
 0x289   : > { %v2215_v46 = vpop.f32.mrf.mxu2 }
 0x28a   : > { %v1859_v14 = vpop.f32.mrf.mxu3  ;;  %v2186_v35 = vpop.f32.mrf.mxu1 }
 0x28b   : > { %v1897_v44 = vadd.f32 %v1859_v14, %v1785_v6 }
 0x28c   : > { %v2095_v48 = vpop.f32.mrf.mxu0 }
 0x28d   : > { %v2108_v56 = vadd.f32 %v2095_v48, %v2003_v29  ;;  %v2008_v41 = vadd.f32 %v3634_v31, %v1897_v44 }
 0x28f   : > { %v2219_v10 = vadd.f32 %v2206_v59, %v2108_v56 }
 0x291   : > { %2227 = vst [vmem:[%s3639_s8 + $0x8] sm:$0xff] %v2219_v10 }
 0x292   : > { %v2066_v49 = vpop.f32.mrf.mxu3 }
 0x293   : > { %v2107_v5 = vadd.f32 %v2066_v49, %v2002_v11 }
 0x294   : > { %v2098_v9 = vpop.f32.mrf.mxu0 }
 0x295   : > { %v2110_v58 = vadd.f32 %v2098_v9, %v2005_v18  ;;  %v2218_v23 = vadd.f32 %v2177_v0, %v2107_v5 }
 0x297   : > { %2226 = vst [vmem:[%s3639_s8] sm:$0xff] %v2218_v23  ;;  %v2221_v3 = vadd.f32 %v2209_v33, %v2110_v58 }
 0x299   : > { %2229 = vst [vmem:[%s3639_s8 + $0x18] sm:$0xff] %v2221_v3 }
 0x29a   : > { %v2069_v40 = vpop.f32.mrf.mxu3 }
 0x29b   : > { %v2109_v47 = vadd.f32 %v2069_v40, %v2004_v43 }
 0x29c   : > { %v2101_v27 = vpop.f32.mrf.mxu0 }
 0x29d   : > { %v2112_v7 = vadd.f32 %v2101_v27, %v2007_v54  ;;  %v2220_v20 = vadd.f32 %v2180_v52, %v2109_v47 }
 0x29f   : > { %2228 = vst [vmem:[%s3639_s8 + $0x10] sm:$0xff] %v2220_v20  ;;  %v2223_v16 = vadd.f32 %v2212_v60, %v2112_v7 }
 0x2a1   : > { %2231 = vst [vmem:[%s3639_s8 + $0x28] sm:$0xff] %v2223_v16 }
 0x2a2   : > { %v2072_v57 = vpop.f32.mrf.mxu3 }
 0x2a3   : > { %v2111_v55 = vadd.f32 %v2072_v57, %v2006_v62 }
 0x2a4   : > { %v2104_v37 = vpop.f32.mrf.mxu0 }
 0x2a5   : > { %v2114_v53 = vadd.f32 %v2104_v37, %v2009_v51  ;;  %v2222_v2 = vadd.f32 %v2183_v17, %v2111_v55 }
 0x2a7   : > { %2230 = vst [vmem:[%s3639_s8 + $0x20] sm:$0xff] %v2222_v2  ;;  %v2225_v21 = vadd.f32 %v2215_v46, %v2114_v53 }
 0x2a9   : > { %2233 = vst [vmem:[%s3639_s8 + $0x38] sm:$0xff] %v2225_v21 }
 0x2aa   : > { %v2075_v45 = vpop.f32.mrf.mxu3 }
 0x2ab   : > { %v2113_v4 = vadd.f32 %v2075_v45, %v2008_v41 }
 0x2ad   : > { %v2224_v19 = vadd.f32 %v2186_v35, %v2113_v4 }
 0x2af   : > { %2232 = vst [vmem:[%s3639_s8 + $0x30] sm:$0xff] %v2224_v19 }
 0x2b0   : > { %2653 = shalt.err (!%p2650_p3)
}
 0x2b1   : > { %s2705_s12 = smov 256   ;;  %s2706_s7 = smov 16  }
 0x2b2   : > { %2567 = dma.vmem_to_hbm [thread:$0]  (%p2775_p5), %s2248_s6, 1024, %s2250_s13, %s2235_s22, %s2705_s12, %s2705_s12, %s2706_s7  }
 0x2b3 PF: > { %p2573_p4 = scmp.ge.s32.totalorder %s2688_s21, 2  ;;  %s2264_s8 = sand.u32 1, %s2676_s18  }
 0x2b4   : > { %s2265_s14 = scalar_lea.sflag [#allocation3], %s2264_s8 }
 0x2b5   : > { %p2570_p7 = pnand %p2573_p4, %p2779_p6 }
 0x2b7   : > { %p2571_p8 = pneg %p2570_p7 }
 0x2b9   : > { %2671 = dma.done.wait (%p2571_p8), %s2265_s14, 1024  }
 0x2ba   : > { %2673 = vsyncadd (%p2571_p8), %s2265_s14, 4294966272  ;;  %p15_p9 = scmp.ge.s32.totalorder %s2762_s24, 4   ;;  %s3723_s18 = smov %s2680_s19 }
 0x2bb   : > { %s3724_s19 = smov %s2684_s20  ;;  %s3725_s20 = smov %s2773_s27 }
 0x2bc   : > { %s3726_s21 = smov %s2762_s24  ;;  %17 = sbr.rel (!%p15_p9) target bundleno = 3 (0x3), region = 109 }
 0x2c1   :  { %2271 = vsyncpa [#allocation3], 1 }
 0x2c2   :  { %2273 = vsyncpa [#allocation3 + $0x1], 1 }

</bundles_post_ra>
